<compile_context>
chip_gen: v7x
topology: tpu7x:2x2x1
jax: 0.10.0
libtpu: 0.0.40
codegen_flags: <defaults>
</compile_context>

<pallas_src>
import jax
import jax.numpy as jnp
from jax import lax
from jax.experimental import pallas as pl
from jax.experimental.pallas import tpu as pltpu


def _upsample_mask_kernel(p_ref, w1_ref, b1_ref, w2t_ref, b2_ref, o_ref):
    # p_ref:   (1, TM, K)     bf16   im2col patches for TM pixels
    # w1_ref:  (K, 256)       bf16   3x3 conv weights, rows ordered (ky, kx, cin)
    # b1_ref:  (1, 256)       f32
    # w2t_ref: (576, 256)     bf16   1x1 conv weights, channel-major
    # b2_ref:  (576, 1)       f32
    # o_ref:   (1, 576, TM)   f32    channel-major output tile (lane dim = spatial)
    patches = p_ref[0]                                        # (TM, K) bf16

    # 3x3 conv as one im2col matmul on the MXU, f32 accumulation.
    acc = jnp.dot(patches, w1_ref[...],
                  preferred_element_type=jnp.float32)         # (TM, 256) f32

    # Bias + ReLU in f32 on the VPU, then round to bf16 for the second push.
    hidden = jnp.maximum(acc + b1_ref[...], 0.0).astype(jnp.bfloat16)   # (TM, 256)

    # 1x1 conv, computed transposed so the output is channel-major:
    #   out_t[c, m] = sum_k w2t[c, k] * hidden[m, k]
    out_t = lax.dot_general(
        w2t_ref[...], hidden,
        dimension_numbers=(((1,), (1,)), ((), ())),
        preferred_element_type=jnp.float32)                   # (576, TM) f32

    o_ref[0] = out_t + b2_ref[...]                            # lane-dense store


def upsample_mask8(x_nchw, w1, b1, w2, b2):
    """x_nchw: (B, C, H, W) float32.  Returns (B, 576, H, W) float32.

    w1: (256, C, 3, 3), b1: (256,), w2: (576, 256, 1, 1), b2: (576,)
    (PyTorch Conv2d weight conventions).
    """
    B, C, H, W = x_nchw.shape
    C_hid = w1.shape[0]                      # 256
    C_out = w2.shape[0]                      # 576
    K = 9 * C
    HW = H * W

    # ---- spatial tiling: TM a multiple of 128, <= 512, dividing HW_pad ----
    HW_pad = pl.cdiv(HW, 128) * 128
    TM = next(t for t in (512, 384, 256, 128) if HW_pad % t == 0)
    num_m = HW_pad // TM

    # ---- glue: im2col + parameter repacking (plain JAX, fused by XLA) ----
    x_nhwc = jnp.transpose(x_nchw, (0, 2, 3, 1))                      # (B,H,W,C)
    xpad = jnp.pad(x_nhwc, ((0, 0), (1, 1), (1, 1), (0, 0)))          # (B,H+2,W+2,C)
    # Feature index = (ky*3 + kx)*C + cin — matches the w1 row ordering below.
    patches = jnp.concatenate(
        [xpad[:, ky:ky + H, kx:kx + W, :] for ky in range(3) for kx in range(3)],
        axis=-1)                                                      # (B,H,W,9*C)
    patches = patches.reshape(B, HW, K)
    if HW_pad != HW:
        patches = jnp.pad(patches, ((0, 0), (0, HW_pad - HW), (0, 0)))
    patches = patches.astype(jnp.bfloat16)                            # (B,HW_pad,K)

    # (256, C, 3, 3) -> (3, 3, C, 256) -> (9*C, 256), rows ordered (ky, kx, cin)
    w1_mat = jnp.transpose(w1, (2, 3, 1, 0)).reshape(K, C_hid).astype(jnp.bfloat16)
    b1_row = b1.reshape(1, C_hid).astype(jnp.float32)
    # (576, 256, 1, 1) -> (576, 256): already channel-major for the transposed matmul.
    w2t_mat = w2.reshape(C_out, C_hid).astype(jnp.bfloat16)
    b2_col = b2.reshape(C_out, 1).astype(jnp.float32)

    flops = 2 * B * HW_pad * (K * C_hid + C_hid * C_out)
    bytes_accessed = (patches.size * 2 + w1_mat.size * 2 + w2t_mat.size * 2
                      + b1_row.size * 4 + b2_col.size * 4
                      + B * C_out * HW_pad * 4)

    out_cm = pl.pallas_call(
        _upsample_mask_kernel,
        out_shape=jax.ShapeDtypeStruct((B, C_out, HW_pad), jnp.float32),
        grid_spec=pltpu.PrefetchScalarGridSpec(
            num_scalar_prefetch=0,
            grid=(B, num_m),
            in_specs=[
                pl.BlockSpec((1, TM, K), lambda b, m: (b, m, 0)),
                # Constant index maps: weights/biases are DMA'd once, not per tile.
                pl.BlockSpec((K, C_hid), lambda b, m: (0, 0)),
                pl.BlockSpec((1, C_hid), lambda b, m: (0, 0)),
                pl.BlockSpec((C_out, C_hid), lambda b, m: (0, 0)),
                pl.BlockSpec((C_out, 1), lambda b, m: (0, 0)),
            ],
            out_specs=pl.BlockSpec((1, C_out, TM), lambda b, m: (b, 0, m)),
        ),
        compiler_params=pltpu.CompilerParams(
            dimension_semantics=("parallel", "parallel"),
            vmem_limit_bytes=32 * 1024 * 1024),
        cost_estimate=pl.CostEstimate(flops=flops, transcendentals=0,
                                      bytes_accessed=bytes_accessed),
    )(patches, w1_mat, b1_row, w2t_mat, b2_col)

    # Output is already channel-major: the NCHW result is just a free reshape.
    # (The slice only materializes a copy when HW is not a multiple of 128.)
    if HW_pad != HW:
        out_cm = out_cm[:, :, :HW]
    return out_cm.reshape(B, C_out, H, W)


def _reference(x_nchw, w1, b1, w2, b2):
    """Pure-JAX f32 NCHW reference matching the PyTorch module."""
    dn = lax.conv_dimension_numbers(x_nchw.shape, w1.shape, ("NCHW", "OIHW", "NCHW"))
    h = lax.conv_general_dilated(x_nchw, w1, (1, 1), ((1, 1), (1, 1)),
                                 dimension_numbers=dn)
    h = h + b1.reshape(1, -1, 1, 1)
    h = jnp.maximum(h, 0.0)
    dn2 = lax.conv_dimension_numbers(h.shape, w2.shape, ("NCHW", "OIHW", "NCHW"))
    o = lax.conv_general_dilated(h, w2, (1, 1), ((0, 0), (0, 0)),
                                 dimension_numbers=dn2)
    return o + b2.reshape(1, -1, 1, 1)


if __name__ == "__main__":
    # Small deterministic problem: dim=4 input channels, 16x16 spatial, batch=2.
    B, C, H, W = 2, 4, 16, 16
    C_hid, C_out = 256, 64 * 9

    key = jax.random.PRNGKey(0)
    k_x, k_w1, k_b1, k_w2, k_b2 = jax.random.split(key, 5)

    x = jax.random.normal(k_x, (B, C, H, W), dtype=jnp.float32)
    w1 = jax.random.normal(k_w1, (C_hid, C, 3, 3), dtype=jnp.float32) * 0.05
    b1 = jax.random.normal(k_b1, (C_hid,), dtype=jnp.float32) * 0.05
    w2 = jax.random.normal(k_w2, (C_out, C_hid, 1, 1), dtype=jnp.float32) * 0.05
    b2 = jax.random.normal(k_b2, (C_out,), dtype=jnp.float32) * 0.05

    out = jax.jit(upsample_mask8)(x, w1, b1, w2, b2)
    out = jax.block_until_ready(out)

    assert out.shape == (B, C_out, H, W), out.shape

    ref = jax.block_until_ready(_reference(x, w1, b1, w2, b2))
    # bf16 matmul operands (f32 accumulation) vs f32 reference: relaxed tolerance.
    max_err = float(jnp.max(jnp.abs(out - ref)))
    assert max_err < 2e-2, max_err

    print("KERNEL_OK")
</pallas_src>

<mosaic_0001>
module attributes {stable_mosaic.version = 11 : i64} {
  func.func @_upsample_mask_kernel(%arg0: i32, %arg1: i32, %arg2: memref<1x256x36xbf16, #tpu.memory_space<vmem>>, %arg3: memref<36x256xbf16, #tpu.memory_space<vmem>>, %arg4: memref<1x256xf32, #tpu.memory_space<vmem>>, %arg5: memref<576x256xbf16, #tpu.memory_space<vmem>>, %arg6: memref<576x1xf32, #tpu.memory_space<vmem>>, %arg7: memref<1x576x256xf32, #tpu.memory_space<vmem>>) attributes {dimension_semantics = [#tpu.dimension_semantics<parallel>, #tpu.dimension_semantics<parallel>], iteration_bounds = array<i64: 2, 1>, scalar_prefetch = 0 : i64, scratch_operands = 0 : i64, tpu.core_type = #tpu.core_type<tc>, window_params = [{transform_indices = @transform_0, window_bounds = array<i64: 1, 256, 36>}, {pipeline_mode = #tpu.pipeline_mode<synchronous>, transform_indices = @transform_1, window_bounds = array<i64: 36, 256>}, {pipeline_mode = #tpu.pipeline_mode<synchronous>, transform_indices = @transform_2, window_bounds = array<i64: 1, 256>}, {pipeline_mode = #tpu.pipeline_mode<synchronous>, transform_indices = @transform_3, window_bounds = array<i64: 576, 256>}, {pipeline_mode = #tpu.pipeline_mode<synchronous>, transform_indices = @transform_4, window_bounds = array<i64: 576, 1>}, {transform_indices = @transform_5, window_bounds = array<i64: 1, 576, 256>}]} {
    %c0 = arith.constant 0 : index
    %c0_0 = arith.constant 0 : index
    %c0_1 = arith.constant 0 : index
    %0 = vector.load %arg2[%c0, %c0_0, %c0_1] : memref<1x256x36xbf16, #tpu.memory_space<vmem>>, vector<1x256x36xbf16>
    %1 = vector.shape_cast %0 : vector<1x256x36xbf16> to vector<256x36xbf16>
    %c0_2 = arith.constant 0 : index
    %c0_3 = arith.constant 0 : index
    %2 = vector.load %arg3[%c0_2, %c0_3] : memref<36x256xbf16, #tpu.memory_space<vmem>>, vector<36x256xbf16>
    %cst = arith.constant dense<0.000000e+00> : vector<256x256xf32>
    %3 = tpu.matmul %1, %2, %cst {dimension_numbers = #tpu.dot_dimension_numbers<[1], [0], [0], [1], [0, 0, 1, 1], [], []>} : vector<256x36xbf16>, vector<36x256xbf16>, vector<256x256xf32> -> vector<256x256xf32>
    %c0_4 = arith.constant 0 : index
    %c0_5 = arith.constant 0 : index
    %4 = vector.load %arg4[%c0_4, %c0_5] : memref<1x256xf32, #tpu.memory_space<vmem>>, vector<1x256xf32>
    %5 = vector.broadcast %4 : vector<1x256xf32> to vector<256x256xf32>
    %6 = arith.addf %3, %5 : vector<256x256xf32>
    %cst_6 = arith.constant 0.000000e+00 : f32
    %7 = vector.broadcast %cst_6 : f32 to vector<256x256xf32>
    %8 = arith.maximumf %6, %7 : vector<256x256xf32>
    %9 = arith.truncf %8 : vector<256x256xf32> to vector<256x256xbf16>
    %c0_7 = arith.constant 0 : index
    %c0_8 = arith.constant 0 : index
    %10 = vector.load %arg5[%c0_7, %c0_8] : memref<576x256xbf16, #tpu.memory_space<vmem>>, vector<576x256xbf16>
    %cst_9 = arith.constant dense<0.000000e+00> : vector<576x256xf32>
    %11 = tpu.matmul %10, %9, %cst_9 {dimension_numbers = #tpu.dot_dimension_numbers<[1], [1], [0], [0], [0, 0, 1, 0], [], []>} : vector<576x256xbf16>, vector<256x256xbf16>, vector<576x256xf32> -> vector<576x256xf32>
    %c0_10 = arith.constant 0 : index
    %c0_11 = arith.constant 0 : index
    %12 = vector.load %arg6[%c0_10, %c0_11] : memref<576x1xf32, #tpu.memory_space<vmem>>, vector<576x1xf32>
    %13 = vector.broadcast %12 : vector<576x1xf32> to vector<576x256xf32>
    %14 = arith.addf %11, %13 : vector<576x256xf32>
    %c0_12 = arith.constant 0 : index
    %c0_13 = arith.constant 0 : index
    %c0_14 = arith.constant 0 : index
    %15 = vector.load %arg7[%c0_12, %c0_13, %c0_14] : memref<1x576x256xf32, #tpu.memory_space<vmem>>, vector<1x576x256xf32>
    %16 = vector.shape_cast %15 : vector<1x576x256xf32> to vector<576x256xf32>
    %17 = vector.shape_cast %14 : vector<576x256xf32> to vector<1x576x256xf32>
    tpu.vector_store %arg7[%c0_12, %c0_13, %c0_14], %17 {strides = array<i32>} : memref<1x576x256xf32, #tpu.memory_space<vmem>>, vector<1x576x256xf32>,
    return
  }
  func.func @transform_0(%arg0: i32, %arg1: i32) -> (i32, i32, i32) {
    %c0_i32 = arith.constant 0 : i32
    %c0_i32_0 = arith.constant 0 : i32
    return %arg0, %arg1, %c0_i32 : i32, i32, i32
  }
  func.func @transform_1(%arg0: i32, %arg1: i32) -> (i32, i32) {
    %c0_i32 = arith.constant 0 : i32
    %c0_i32_0 = arith.constant 0 : i32
    %c0_i32_1 = arith.constant 0 : i32
    return %c0_i32, %c0_i32_0 : i32, i32
  }
  func.func @transform_2(%arg0: i32, %arg1: i32) -> (i32, i32) {
    %c0_i32 = arith.constant 0 : i32
    %c0_i32_0 = arith.constant 0 : i32
    %c0_i32_1 = arith.constant 0 : i32
    return %c0_i32, %c0_i32_0 : i32, i32
  }
  func.func @transform_3(%arg0: i32, %arg1: i32) -> (i32, i32) {
    %c0_i32 = arith.constant 0 : i32
    %c0_i32_0 = arith.constant 0 : i32
    %c0_i32_1 = arith.constant 0 : i32
    return %c0_i32, %c0_i32_0 : i32, i32
  }
  func.func @transform_4(%arg0: i32, %arg1: i32) -> (i32, i32) {
    %c0_i32 = arith.constant 0 : i32
    %c0_i32_0 = arith.constant 0 : i32
    %c0_i32_1 = arith.constant 0 : i32
    return %c0_i32, %c0_i32_0 : i32, i32
  }
  func.func @transform_5(%arg0: i32, %arg1: i32) -> (i32, i32, i32) {
    %c0_i32 = arith.constant 0 : i32
    %c0_i32_0 = arith.constant 0 : i32
    return %arg0, %c0_i32, %arg1 : i32, i32, i32
  }
}

</mosaic_0001>

<bundles_post_ra>
// kernel: upsample_mask8.1
= control target key start
LH: loop header
LB: loop body
LE: loop exit
PB: predicated region body
PF: predicated region fallthrough
CT: control target
= control target key end

     0   :  { %s2621_s18 = smov 0   ;;  %s2623_s19 = smov 0   ;;  %s3510_s0 = inlined_call_operand.vmem [shape: bf16[2,256,36], index: 0, kind: input, shape index: {}]   ;;  %s3511_s1 = inlined_call_operand.vmem [shape: bf16[36,256], index: 1, kind: input, shape index: {}]   ;;  %s3512_s2 = inlined_call_operand.vmem [shape: f32[1,256], index: 2, kind: input, shape index: {}]   ;;  %s3513_s3 = inlined_call_operand.vmem [shape: bf16[576,256], index: 3, kind: input, shape index: {}]   ;;  %s3514_s4 = inlined_call_operand.vmem [shape: f32[576,1], index: 4, kind: input, shape index: {}]   ;;  %s3515_s5 = inlined_call_operand.vmem [shape: f32[2,576,256], index: 5, kind: output, shape index: {}]  }
   0x1   :  { %s2625_s20 = smov 0  }
   0x2 LB: > { %s27_s21 = sadd.s32 1, %s2584_s19  ;;  %p2256_p0 = scmp.ge.s32.totalorder %s2588_s20, 1  ;;  %s2588_s20 = sphi %s2625_s20, %s15_s20   ;;  %s2584_s19 = sphi %s2623_s19, %s3517_s19   ;;  %s2580_s18 = sphi %s2621_s18, %s3516_s18  }
   0x3   : > { %p29_p1 = scmp.ge.s32.totalorder %s27_s21, 2  ;;  %p208_p2 = scmp.lt.s32.totalorder %s2588_s20, 3 }
   0x5   : > { %s3519_s21 = smov (%p29_p1, %s27_s21), 0  ;;  %p209_p3 = pnand %p2256_p0, %p208_p2 }
   0x6   : > { %v2434_v0 = vld [vmem:[%s3511_s1 + $0x4] ss:$8 sps:$4 sm:$0xff] (!%p209_p3)   ;;  %v2436_v1 = vld [vmem:[%s3511_s1] ss:$8 sps:$4 sm:$0xff] (!%p209_p3)   ;;  %v2590_v2 = vmov (!%p209_p3), 0   ;;  %p245_p4 = scmp.lt.s32.totalorder (!%p209_p3), %s2580_s18, 1  ;;  %v304_v39 = vlaneseq (!%p209_p3) }
   0x7   : > { %212 = sbr.rel (%p209_p3) target bundleno = 731 (0x2db), region = 40  ;;  %507 = vmatprep.mubr.bf16.mxu0 (!%p209_p3), %v2590_v2  ;;  %2433 = vset.pattern.permute.xlu1 (!%p209_p3), %v2590_v2  ;;  %v2437_v3 = vld [vmem:[%s3511_s1 + $0x14] ss:$8 sps:$4 sm:$0xff] (!%p209_p3)   ;;  %v2439_v4 = vld [vmem:[%s3511_s1 + $0x10] ss:$8 sps:$4 sm:$0xff] (!%p209_p3)   ;;  %vm468_vm0 = vcmask (!%p209_p3), 1041408  }
   0x8   : > { %475 = vmatprep.subr.bf16.mxu0 (!%p209_p3), %v2434_v0  ;;  %v301_v5 = vld [vmem:[%s3511_s1 + $0x20] sm:$0x33] (!%p209_p3)  ;;  %2432 = vset.pattern.permute.xlu0 (!%p209_p3), %v2590_v2  ;;  %vm419_vm1 = vcmask (!%p209_p3), 293888   ;;  %v838_v25 = vld [vmem:[%s3514_s4 + $0x10] sm:$0xff] (!%p209_p3)  ;;  %v839_v27 = vld [vmem:[%s3514_s4 + $0x18] sm:$0xff] (!%p209_p3)  ;;  %v305_v42 = vshrl.u32 (!%p209_p3), %v304_v39, 7 }
   0x9   : > { %476 = vmatpush1.bf16.msra.mxu0 (!%p209_p3), %v2436_v1  ;;  %v2281_v6 = vcombine.high (!%p209_p3), %v301_v5, %v301_v5  ;;  %v2280_v7 = vcombine.low (!%p209_p3), %v301_v5, %v301_v5  ;;  %v836_v26 = vld [vmem:[%s3514_s4] sm:$0xff] (!%p209_p3)  ;;  %920 = vperm.xlu1 (!%p209_p3), %2433, %v838_v25   ;;  %v837_v28 = vld [vmem:[%s3514_s4 + $0x8] sm:$0xff] (!%p209_p3)  ;;  %v843_v31 = vld [vmem:[%s3514_s4 + $0x38] sm:$0xff] (!%p209_p3) }
   0xa   : > { %477 = vmatprep.subr.bf16.mxu0 (!%p209_p3), %v2437_v3  ;;  %910 = vperm.xlu0 (!%p209_p3), %2432, %v836_v26   ;;  %v841_v29 = vld [vmem:[%s3514_s4 + $0x28] sm:$0xff] (!%p209_p3)  ;;  %v840_v30 = vld [vmem:[%s3514_s4 + $0x20] sm:$0xff] (!%p209_p3)  ;;  %v842_v32 = vld [vmem:[%s3514_s4 + $0x30] sm:$0xff] (!%p209_p3)  ;;  %v306_v45 = vsub.s32 (!%p209_p3), 0, %v305_v42  ;;  %v310_v47 = vsub.s32 (!%p209_p3), 1, %v305_v42 }
   0xb   : > { %v470_v8 = vsel (!%p209_p3), %vm468_vm0, %v2280_v7, 0  ;;  %v845_v33 = vld [vmem:[%s3514_s4 + $0x48] sm:$0xff] (!%p209_p3)  ;;  %v844_v34 = vld [vmem:[%s3514_s4 + $0x40] sm:$0xff] (!%p209_p3)  ;;  %v847_v35 = vld [vmem:[%s3514_s4 + $0x58] sm:$0xff] (!%p209_p3) }
   0xc   : > { %v846_v36 = vld [vmem:[%s3514_s4 + $0x50] sm:$0xff] (!%p209_p3)  ;;  %v849_v37 = vld [vmem:[%s3514_s4 + $0x68] sm:$0xff] (!%p209_p3)  ;;  %v848_v38 = vld [vmem:[%s3514_s4 + $0x60] sm:$0xff] (!%p209_p3) }
   0xd   : > { %478 = vmatpush1.bf16.msra.mxu0 (!%p209_p3), %v2439_v4  ;;  %925 = vperm.xlu1 (!%p209_p3), %2433, %v839_v27   ;;  %v851_v40 = vld [vmem:[%s3514_s4 + $0x78] sm:$0xff] (!%p209_p3)  ;;  %v850_v41 = vld [vmem:[%s3514_s4 + $0x70] sm:$0xff] (!%p209_p3)  ;;  %v853_v43 = vld [vmem:[%s3514_s4 + $0x88] sm:$0xff] (!%p209_p3) }
   0xe   : > { %s3521_s18 = smov (!%p245_p4, %s2580_s18), 1  ;;  %2282 = vmatprep.subr.msk.bf16.mxu0 %vm468_vm0, %v2281_v6  ;;  %915 = vperm.xlu0 %2432, %v837_v28   ;;  %v852_v44 = vld [vmem:[%s3514_s4 + $0x80] sm:$0xff]  ;;  %v855_v48 = vld [vmem:[%s3514_s4 + $0x98] sm:$0xff]  ;;  %v854_v49 = vld [vmem:[%s3514_s4 + $0x90] sm:$0xff] }
   0xf   : > { %s2373_s7 = sshll.u32 %s3521_s18, 7  ;;  %v302_v46 = vld [vmem:[%s3512_s2] sm:$0x3]  ;;  %v857_v53 = vld [vmem:[%s3514_s4 + $0xa8] sm:$0xff]  ;;  %v859_v61 = vld [vmem:[%s3514_s4 + $0xb8] sm:$0xff] }
  0x10   : > { %s2663_s10 = scalar_lea.vmem %s3510_s0, %s2373_s7  ;;  %v2775_v50 = vrot.slane %v302_v46, %v306_v45  ;;  %v2777_v51 = vrot.slane %v302_v46, %v310_v47  ;;  %v856_v54 = vld [vmem:[%s3514_s4 + $0xa0] sm:$0xff]  ;;  %v858_v62 = vld [vmem:[%s3514_s4 + $0xb0] sm:$0xff]  ;;  %v861_v6 = vld [vmem:[%s3514_s4 + $0xc8] sm:$0xff]  ;;  %s2406_s7 = smul.u32 1152, %s3521_s18 }
  0x11   : > { %v2442_v9 = vld [vmem:[%s2663_s10] sm:$0xff]   ;;  %480 = vmatpush1.bf16.msra.mxu0 %v470_v8  ;;  %v2443_v10 = vld [vmem:[%s2663_s10 + $0x8] sm:$0xff]   ;;  %v2444_v11 = vld [vmem:[%s2663_s10 + $0x10] sm:$0xff]   ;;  %935 = vperm.xlu1 %2433, %v841_v29  }
  0x12   : > { %v2445_v12 = vld [vmem:[%s2663_s10 + $0x18] sm:$0xff]   ;;  %v2446_v13 = vld [vmem:[%s2663_s10 + $0x20] sm:$0xff]   ;;  %v2447_v14 = vld [vmem:[%s2663_s10 + $0x28] sm:$0xff]   ;;  %930 = vperm.xlu0 %2432, %v840_v30  }
  0x13   : > { %v2448_v15 = vld [vmem:[%s2663_s10 + $0x30] sm:$0xff]   ;;  %v2449_v16 = vld [vmem:[%s2663_s10 + $0x38] sm:$0xff]   ;;  %v2450_v17 = vld [vmem:[%s2663_s10 + $0x40] sm:$0xff]  }
  0x14   : > { %2283 = vmatmul.mubr.msk.bf16.vlgmr.msra.gmra.mrb[0].mxu0 %vm419_vm1, %v2442_v9  ;;  %v2451_v18 = vld [vmem:[%s2663_s10 + $0x48] sm:$0xff]   ;;  %v2452_v19 = vld [vmem:[%s2663_s10 + $0x50] sm:$0xff]   ;;  %v2453_v20 = vld [vmem:[%s2663_s10 + $0x58] sm:$0xff]  }
  0x15   : > { %517 = vmatprep.mubr.bf16.mxu0 %v2590_v2  ;;  %v2454_v21 = vld [vmem:[%s2663_s10 + $0x60] sm:$0xff]   ;;  %v2455_v22 = vld [vmem:[%s2663_s10 + $0x68] sm:$0xff]   ;;  %v2456_v23 = vld [vmem:[%s2663_s10 + $0x70] sm:$0xff]   ;;  %945 = vperm.xlu1 %2433, %v843_v31  }
  0x16   : > { %v2457_v24 = vld [vmem:[%s2663_s10 + $0x78] sm:$0xff]   ;;  %940 = vperm.xlu0 %2432, %v842_v32   ;;  %v2463_v3 = vld [vmem:[%s3513_s3 + $0x4] ss:$8 sps:$4 sm:$0xff]   ;;  %s3287_s10 = scalar_lea.vmem %s3515_s5, %s2406_s7 }
  0x17   : > { %v2460_v0 = vld [vmem:[%s3513_s3 + $0x114] ss:$8 sps:$4 sm:$0xff]   ;;  %v860_v7 = vld [vmem:[%s3514_s4 + $0xc0] sm:$0xff]  ;;  %v869_v42 = vld [vmem:[%s3514_s4 + $0x108] sm:$0xff] }
  0x18   : > { %1830 = vmatprep.mubr.bf16.mxu1 %v2460_v0  ;;  %v864_v25 = vld [vmem:[%s3514_s4 + $0xe0] sm:$0xff] }
  0x19   : > { %955 = vperm.xlu1 %2433, %v845_v33   ;;  %v867_v33 = vld [vmem:[%s3514_s4 + $0xf8] sm:$0xff] }
  0x1a   : > { %950 = vperm.xlu0 %2432, %v844_v34   ;;  %v866_v34 = vld [vmem:[%s3514_s4 + $0xf0] sm:$0xff] }
  0x1c   : > { %2284 = vmatmul.mubr.msk.bf16.gmra.mrb[4].mxu0 %vm419_vm1, %v2443_v10 }
  0x1d   : > { %527 = vmatprep.mubr.bf16.mxu0 %v2590_v2  ;;  %965 = vperm.xlu1 %2433, %v847_v35  }
  0x1e   : > { %960 = vperm.xlu0 %2432, %v846_v36  }
  0x21   : > { %975 = vperm.xlu1 %2433, %v849_v37  }
  0x22   : > { %970 = vperm.xlu0 %2432, %v848_v38  }
  0x24   : > { %2285 = vmatmul.mubr.msk.bf16.gmra.mrb[8].mxu0 %vm419_vm1, %v2444_v11 }
  0x25   : > { %537 = vmatprep.mubr.bf16.mxu0 %v2590_v2  ;;  %985 = vperm.xlu1 %2433, %v851_v40  }
  0x26   : > { %980 = vperm.xlu0 %2432, %v850_v41  }
  0x29   : > { %995 = vperm.xlu1 %2433, %v853_v43   ;;  %v868_v43 = vld [vmem:[%s3514_s4 + $0x100] sm:$0xff] }
  0x2a   : > { %990 = vperm.xlu0 %2432, %v852_v44  }
  0x2c   : > { %2286 = vmatmul.mubr.msk.bf16.gmra.mrb[12].mxu0 %vm419_vm1, %v2445_v12 }
  0x2d   : > { %547 = vmatprep.mubr.bf16.mxu0 %v2590_v2  ;;  %1005 = vperm.xlu1 %2433, %v855_v48  }
  0x2e   : > { %1000 = vperm.xlu0 %2432, %v854_v49  }
  0x31   : > { %1015 = vperm.xlu1 %2433, %v857_v53   ;;  %v871_v53 = vld [vmem:[%s3514_s4 + $0x118] sm:$0xff] }
  0x32   : > { %1010 = vperm.xlu0 %2432, %v856_v54   ;;  %v870_v54 = vld [vmem:[%s3514_s4 + $0x110] sm:$0xff] }
  0x34   : > { %2287 = vmatmul.mubr.msk.bf16.gmra.mrb[16].mxu0 %vm419_vm1, %v2446_v13 }
  0x35   : > { %557 = vmatprep.mubr.bf16.mxu0 %v2590_v2  ;;  %1025 = vperm.xlu1 %2433, %v859_v61  }
  0x36   : > { %1020 = vperm.xlu0 %2432, %v858_v62   ;;  %v873_v62 = vld [vmem:[%s3514_s4 + $0x128] sm:$0xff] }
  0x39   : > { %1035 = vperm.xlu1 %2433, %v861_v6  }
  0x3a   : > { %1030 = vperm.xlu0 %2432, %v860_v7   ;;  %v875_v7 = vld [vmem:[%s3514_s4 + $0x138] sm:$0xff] }
  0x3c   : > { %2288 = vmatmul.mubr.msk.bf16.gmra.mrb[20].mxu0 %vm419_vm1, %v2447_v14 }
  0x3d   : > { %567 = vmatprep.mubr.bf16.mxu0 %v2590_v2 }
  0x44   : > { %2289 = vmatmul.mubr.msk.bf16.gmra.mrb[24].mxu0 %vm419_vm1, %v2448_v15  ;;  %v863_v15 = vld [vmem:[%s3514_s4 + $0xd8] sm:$0xff] }
  0x45   : > { %577 = vmatprep.mubr.bf16.mxu0 %v2590_v2  ;;  %1045 = vperm.xlu1 %2433, %v863_v15  }
  0x4c   : > { %2290 = vmatmul.mubr.msk.bf16.gmra.mrb[28].mxu0 %vm419_vm1, %v2449_v16  ;;  %v862_v16 = vld [vmem:[%s3514_s4 + $0xd0] sm:$0xff] }
  0x4d   : > { %587 = vmatprep.mubr.bf16.mxu0 %v2590_v2  ;;  %1040 = vperm.xlu0 %2432, %v862_v16   ;;  %v877_v16 = vld [vmem:[%s3514_s4 + $0x148] sm:$0xff] }
  0x51   : > { %1050 = vperm.xlu0 %2432, %v864_v25   ;;  %v879_v25 = vld [vmem:[%s3514_s4 + $0x158] sm:$0xff] }
  0x54   : > { %2291 = vmatmul.mubr.msk.bf16.gmra.mrb[32].mxu0 %vm419_vm1, %v2450_v17 }
  0x55   : > { %597 = vmatprep.mubr.bf16.mxu0 %v2590_v2  ;;  %1060 = vperm.xlu0 %2432, %v866_v34   ;;  %v881_v34 = vld [vmem:[%s3514_s4 + $0x168] sm:$0xff] }
  0x59   : > { %1070 = vperm.xlu0 %2432, %v868_v43   ;;  %v883_v43 = vld [vmem:[%s3514_s4 + $0x178] sm:$0xff] }
  0x5c   : > { %2292 = vmatmul.mubr.msk.bf16.gmra.mrb[36].mxu0 %vm419_vm1, %v2451_v18 }
  0x5d   : > { %607 = vmatprep.mubr.bf16.mxu0 %v2590_v2  ;;  %1080 = vperm.xlu0 %2432, %v870_v54   ;;  %v885_v54 = vld [vmem:[%s3514_s4 + $0x188] sm:$0xff] }
  0x64   : > { %2293 = vmatmul.mubr.msk.bf16.gmra.mrb[40].mxu0 %vm419_vm1, %v2452_v19 }
  0x65   : > { %617 = vmatprep.mubr.bf16.mxu0 %v2590_v2 }
  0x6c   : > { %2294 = vmatmul.mubr.msk.bf16.gmra.mrb[44].mxu0 %vm419_vm1, %v2453_v20 }
  0x6d   : > { %627 = vmatprep.mubr.bf16.mxu0 %v2590_v2 }
  0x74   : > { %2295 = vmatmul.mubr.msk.bf16.gmra.mrb[48].mxu0 %vm419_vm1, %v2454_v21 }
  0x75   : > { %637 = vmatprep.mubr.bf16.mxu0 %v2590_v2 }
  0x7c   : > { %2296 = vmatmul.mubr.msk.bf16.gmra.mrb[52].mxu0 %vm419_vm1, %v2455_v22 }
  0x7d   : > { %647 = vmatprep.mubr.bf16.mxu0 %v2590_v2 }
  0x84   : > { %2297 = vmatmul.mubr.msk.bf16.gmra.mrb[56].mxu0 %vm419_vm1, %v2456_v23 }
  0x85   : > { %657 = vmatprep.mubr.bf16.mxu0 %v2590_v2 }
  0x8c   : > { %2298 = vmatmul.mubr.msk.bf16.gmra.mrb[60].mxu0 %vm419_vm1, %v2457_v24  ;;  %v865_v24 = vld [vmem:[%s3514_s4 + $0xe8] sm:$0xff] }
  0x8d   : > { %1660 = vmatprep.mubr.bf16.mxu0 %v2463_v3  ;;  %1055 = vperm.xlu1 %2433, %v865_v24  }
  0x91   : > { %1065 = vperm.xlu1 %2433, %v867_v33  }
  0x95   : > { %1075 = vperm.xlu1 %2433, %v869_v42  }
  0x99   : > { %1085 = vperm.xlu1 %2433, %v871_v53  }
  0x9d   : > { %1095 = vperm.xlu1 %2433, %v873_v62  }
  0xa1   : > { %1105 = vperm.xlu1 %2433, %v875_v7  }
  0xa5   : > { %1115 = vperm.xlu1 %2433, %v877_v16  }
  0xa9   : > { %1125 = vperm.xlu1 %2433, %v879_v25  }
  0xad   : > { %1135 = vperm.xlu1 %2433, %v881_v34  }
  0xb1   : > { %1145 = vperm.xlu1 %2433, %v883_v43  }
  0xb5   : > { %1155 = vperm.xlu1 %2433, %v885_v54  }
  0xe7   : > { %v509_v52 = vpop.f32.mrb[0].mxu0 }
  0xe8   : > { %v510_v55 = vadd.f32 %v509_v52, %v2775_v50  ;;  %v511_v56 = vpop.f32.mrb[1].mxu0 }
  0xe9   : > { %v512_v57 = vadd.f32 %v511_v56, %v2777_v51  ;;  %v513_v58 = vpop.f32.mrb[2].mxu0 }
  0xea   : > { %v514_v59 = vadd.f32 %v513_v58, %v2775_v50  ;;  %v515_v60 = vpop.f32.mrb[3].mxu0  ;;  %v668_v1 = vmax.f32 %v510_v55, 0.0 }
  0xeb   : > { %v516_v63 = vadd.f32 %v515_v60, %v2777_v51  ;;  %v669_v4 = vmax.f32 %v512_v57, 0.0 }
  0xec   : > { %v670_v2 = vmax.f32 %v514_v59, 0.0 }
  0xed   : > { %v671_v5 = vmax.f32 %v516_v63, 0.0  ;;  %v872_v63 = vld [vmem:[%s3514_s4 + $0x120] sm:$0xff] }
  0xee   : > { %v732_v8 = vpack.c.bf16 %v670_v2, %v668_v1  ;;  %1090 = vperm.xlu0 %2432, %v872_v63   ;;  %v887_v63 = vld [vmem:[%s3514_s4 + $0x198] sm:$0xff] }
  0xef   : > { %v733_v9 = vpack.c.bf16 %v671_v5, %v669_v4  ;;  %v519_v10 = vpop.f32.mrb[4].mxu0  ;;  %1165 = vperm.xlu1 %2433, %v887_v63  }
  0xf0   : > { %v520_v11 = vadd.f32 %v519_v10, %v2775_v50  ;;  %v521_v12 = vpop.f32.mrb[5].mxu0 }
  0xf1   : > { %v522_v13 = vadd.f32 %v521_v12, %v2777_v51  ;;  %v523_v14 = vpop.f32.mrb[6].mxu0  ;;  %1628 = vmatprep.subr.bf16.mxu0 %v733_v9  ;;  %2374 = vmatprep.subr.bf16.mxu1 %v733_v9 }
  0xf2   : > { %v524_v17 = vadd.f32 %v523_v14, %v2775_v50  ;;  %v525_v18 = vpop.f32.mrb[7].mxu0  ;;  %1629 = vmatpush1.bf16.xpose.msra.mxu0 %v732_v8  ;;  %2390 = vmatpush1.bf16.xpose.msra.mxu1 %v732_v8  ;;  %v672_v20 = vmax.f32 %v520_v11, 0.0  ;;  %v874_v8 = vld [vmem:[%s3514_s4 + $0x130] sm:$0xff] }
  0xf3   : > { %v526_v19 = vadd.f32 %v525_v18, %v2777_v51  ;;  %v673_v22 = vmax.f32 %v522_v13, 0.0  ;;  %1100 = vperm.xlu0 %2432, %v874_v8   ;;  %v889_v8 = vld [vmem:[%s3514_s4 + $0x1a8] sm:$0xff] }
  0xf4   : > { %v674_v21 = vmax.f32 %v524_v17, 0.0  ;;  %v876_v17 = vld [vmem:[%s3514_s4 + $0x140] sm:$0xff]  ;;  %1175 = vperm.xlu1 %2433, %v889_v8  }
  0xf5   : > { %v675_v23 = vmax.f32 %v526_v19, 0.0 }
  0xf6   : > { %v734_v26 = vpack.c.bf16 %v674_v21, %v672_v20 }
  0xf7   : > { %v735_v27 = vpack.c.bf16 %v675_v23, %v673_v22  ;;  %v529_v28 = vpop.f32.mrb[8].mxu0  ;;  %1110 = vperm.xlu0 %2432, %v876_v17   ;;  %v891_v17 = vld [vmem:[%s3514_s4 + $0x1b8] sm:$0xff] }
  0xf8   : > { %v530_v29 = vadd.f32 %v529_v28, %v2775_v50  ;;  %v531_v30 = vpop.f32.mrb[9].mxu0  ;;  %1185 = vperm.xlu1 %2433, %v891_v17  }
  0xf9   : > { %v532_v31 = vadd.f32 %v531_v30, %v2777_v51  ;;  %v533_v32 = vpop.f32.mrb[10].mxu0  ;;  %1630 = vmatprep.subr.bf16.mxu0 %v735_v27  ;;  %2375 = vmatprep.subr.bf16.mxu1 %v735_v27 }
  0xfa   : > { %v534_v35 = vadd.f32 %v533_v32, %v2775_v50  ;;  %v535_v36 = vpop.f32.mrb[11].mxu0  ;;  %1631 = vmatpush1.bf16.xpose.msra.mxu0 %v734_v26  ;;  %2391 = vmatpush1.bf16.xpose.msra.mxu1 %v734_v26  ;;  %v676_v38 = vmax.f32 %v530_v29, 0.0  ;;  %v878_v26 = vld [vmem:[%s3514_s4 + $0x150] sm:$0xff] }
  0xfb   : > { %v536_v37 = vadd.f32 %v535_v36, %v2777_v51  ;;  %v677_v40 = vmax.f32 %v532_v31, 0.0  ;;  %1120 = vperm.xlu0 %2432, %v878_v26   ;;  %v893_v26 = vld [vmem:[%s3514_s4 + $0x1c8] sm:$0xff] }
  0xfc   : > { %v678_v39 = vmax.f32 %v534_v35, 0.0  ;;  %v880_v35 = vld [vmem:[%s3514_s4 + $0x160] sm:$0xff]  ;;  %1195 = vperm.xlu1 %2433, %v893_v26  }
  0xfd   : > { %v679_v41 = vmax.f32 %v536_v37, 0.0 }
  0xfe   : > { %v736_v44 = vpack.c.bf16 %v678_v39, %v676_v38 }
  0xff   : > { %v737_v45 = vpack.c.bf16 %v679_v41, %v677_v40  ;;  %v539_v46 = vpop.f32.mrb[12].mxu0  ;;  %1130 = vperm.xlu0 %2432, %v880_v35   ;;  %v895_v35 = vld [vmem:[%s3514_s4 + $0x1d8] sm:$0xff] }
 0x100   : > { %v540_v47 = vadd.f32 %v539_v46, %v2775_v50  ;;  %v541_v48 = vpop.f32.mrb[13].mxu0  ;;  %1205 = vperm.xlu1 %2433, %v895_v35  }
 0x101   : > { %v542_v49 = vadd.f32 %v541_v48, %v2777_v51  ;;  %v543_v52 = vpop.f32.mrb[14].mxu0  ;;  %1632 = vmatprep.subr.bf16.mxu0 %v737_v45  ;;  %2376 = vmatprep.subr.bf16.mxu1 %v737_v45 }
 0x102   : > { %v544_v55 = vadd.f32 %v543_v52, %v2775_v50  ;;  %v545_v56 = vpop.f32.mrb[15].mxu0  ;;  %1633 = vmatpush1.bf16.xpose.msra.mxu0 %v736_v44  ;;  %2392 = vmatpush1.bf16.xpose.msra.mxu1 %v736_v44  ;;  %v680_v58 = vmax.f32 %v540_v47, 0.0  ;;  %v882_v44 = vld [vmem:[%s3514_s4 + $0x170] sm:$0xff] }
 0x103   : > { %v546_v57 = vadd.f32 %v545_v56, %v2777_v51  ;;  %v681_v60 = vmax.f32 %v542_v49, 0.0  ;;  %1140 = vperm.xlu0 %2432, %v882_v44   ;;  %v897_v44 = vld [vmem:[%s3514_s4 + $0x1e8] sm:$0xff] }
 0x104   : > { %v682_v59 = vmax.f32 %v544_v55, 0.0  ;;  %v884_v55 = vld [vmem:[%s3514_s4 + $0x180] sm:$0xff]  ;;  %1215 = vperm.xlu1 %2433, %v897_v44  }
 0x105   : > { %v683_v61 = vmax.f32 %v546_v57, 0.0 }
 0x106   : > { %v738_v0 = vpack.c.bf16 %v682_v59, %v680_v58 }
 0x107   : > { %v739_v1 = vpack.c.bf16 %v683_v61, %v681_v60  ;;  %v549_v2 = vpop.f32.mrb[16].mxu0  ;;  %1150 = vperm.xlu0 %2432, %v884_v55   ;;  %v899_v55 = vld [vmem:[%s3514_s4 + $0x1f8] sm:$0xff] }
 0x108   : > { %v550_v3 = vadd.f32 %v549_v2, %v2775_v50  ;;  %v551_v4 = vpop.f32.mrb[17].mxu0  ;;  %1225 = vperm.xlu1 %2433, %v899_v55  }
 0x109   : > { %v552_v5 = vadd.f32 %v551_v4, %v2777_v51  ;;  %v553_v6 = vpop.f32.mrb[18].mxu0  ;;  %1634 = vmatprep.subr.bf16.mxu0 %v739_v1  ;;  %2377 = vmatprep.subr.bf16.mxu1 %v739_v1 }
 0x10a   : > { %v554_v9 = vadd.f32 %v553_v6, %v2775_v50  ;;  %v555_v10 = vpop.f32.mrb[19].mxu0  ;;  %1635 = vmatpush1.bf16.xpose.msra.mxu0 %v738_v0  ;;  %2393 = vmatpush1.bf16.xpose.msra.mxu1 %v738_v0  ;;  %v684_v12 = vmax.f32 %v550_v3, 0.0  ;;  %v886_v0 = vld [vmem:[%s3514_s4 + $0x190] sm:$0xff] }
 0x10b   : > { %v556_v11 = vadd.f32 %v555_v10, %v2777_v51  ;;  %v685_v14 = vmax.f32 %v552_v5, 0.0  ;;  %1160 = vperm.xlu0 %2432, %v886_v0   ;;  %v901_v0 = vld [vmem:[%s3514_s4 + $0x208] sm:$0xff] }
 0x10c   : > { %v686_v13 = vmax.f32 %v554_v9, 0.0  ;;  %v888_v9 = vld [vmem:[%s3514_s4 + $0x1a0] sm:$0xff]  ;;  %1235 = vperm.xlu1 %2433, %v901_v0  }
 0x10d   : > { %v687_v15 = vmax.f32 %v556_v11, 0.0 }
 0x10e   : > { %v740_v18 = vpack.c.bf16 %v686_v13, %v684_v12 }
 0x10f   : > { %v741_v19 = vpack.c.bf16 %v687_v15, %v685_v14  ;;  %v559_v20 = vpop.f32.mrb[20].mxu0  ;;  %1170 = vperm.xlu0 %2432, %v888_v9   ;;  %v903_v9 = vld [vmem:[%s3514_s4 + $0x218] sm:$0xff] }
 0x110   : > { %v560_v21 = vadd.f32 %v559_v20, %v2775_v50  ;;  %v561_v22 = vpop.f32.mrb[21].mxu0  ;;  %1245 = vperm.xlu1 %2433, %v903_v9  }
 0x111   : > { %v562_v23 = vadd.f32 %v561_v22, %v2777_v51  ;;  %v563_v24 = vpop.f32.mrb[22].mxu0  ;;  %1636 = vmatprep.subr.bf16.mxu0 %v741_v19  ;;  %2378 = vmatprep.subr.bf16.mxu1 %v741_v19 }
 0x112   : > { %v564_v27 = vadd.f32 %v563_v24, %v2775_v50  ;;  %v565_v28 = vpop.f32.mrb[23].mxu0  ;;  %1637 = vmatpush1.bf16.xpose.msra.mxu0 %v740_v18  ;;  %2394 = vmatpush1.bf16.xpose.msra.mxu1 %v740_v18  ;;  %v688_v30 = vmax.f32 %v560_v21, 0.0  ;;  %v890_v18 = vld [vmem:[%s3514_s4 + $0x1b0] sm:$0xff] }
 0x113   : > { %v566_v29 = vadd.f32 %v565_v28, %v2777_v51  ;;  %v689_v32 = vmax.f32 %v562_v23, 0.0  ;;  %1180 = vperm.xlu0 %2432, %v890_v18   ;;  %v905_v18 = vld [vmem:[%s3514_s4 + $0x228] sm:$0xff] }
 0x114   : > { %v690_v31 = vmax.f32 %v564_v27, 0.0  ;;  %v892_v27 = vld [vmem:[%s3514_s4 + $0x1c0] sm:$0xff]  ;;  %1255 = vperm.xlu1 %2433, %v905_v18   ;;  %v2458_v18 = vld [vmem:[%s3513_s3 + $0x110] ss:$8 sps:$4 sm:$0xff]  }
 0x115   : > { %v691_v33 = vmax.f32 %v566_v29, 0.0 }
 0x116   : > { %v742_v36 = vpack.c.bf16 %v690_v31, %v688_v30 }
 0x117   : > { %v743_v37 = vpack.c.bf16 %v691_v33, %v689_v32  ;;  %v569_v38 = vpop.f32.mrb[24].mxu0  ;;  %1190 = vperm.xlu0 %2432, %v892_v27   ;;  %v907_v27 = vld [vmem:[%s3514_s4 + $0x238] sm:$0xff] }
 0x118   : > { %v570_v39 = vadd.f32 %v569_v38, %v2775_v50  ;;  %v571_v40 = vpop.f32.mrb[25].mxu0  ;;  %1265 = vperm.xlu1 %2433, %v907_v27   ;;  %v2478_v27 = vld [vmem:[%s3513_s3 + $0x144] ss:$8 sps:$4 sm:$0xff]  }
 0x119   : > { %v572_v41 = vadd.f32 %v571_v40, %v2777_v51  ;;  %v573_v42 = vpop.f32.mrb[26].mxu0  ;;  %1638 = vmatprep.subr.bf16.mxu0 %v743_v37  ;;  %2379 = vmatprep.subr.bf16.mxu1 %v743_v37 }
 0x11a   : > { %v574_v45 = vadd.f32 %v573_v42, %v2775_v50  ;;  %v575_v46 = vpop.f32.mrb[27].mxu0  ;;  %1639 = vmatpush1.bf16.xpose.msra.mxu0 %v742_v36  ;;  %2395 = vmatpush1.bf16.xpose.msra.mxu1 %v742_v36  ;;  %v692_v48 = vmax.f32 %v570_v39, 0.0  ;;  %v894_v36 = vld [vmem:[%s3514_s4 + $0x1d0] sm:$0xff] }
 0x11b   : > { %v576_v47 = vadd.f32 %v575_v46, %v2777_v51  ;;  %v693_v52 = vmax.f32 %v572_v41, 0.0  ;;  %1200 = vperm.xlu0 %2432, %v894_v36  }
 0x11c   : > { %v694_v49 = vmax.f32 %v574_v45, 0.0  ;;  %v896_v45 = vld [vmem:[%s3514_s4 + $0x1e0] sm:$0xff] }
 0x11d   : > { %v695_v53 = vmax.f32 %v576_v47, 0.0 }
 0x11e   : > { %v744_v56 = vpack.c.bf16 %v694_v49, %v692_v48 }
 0x11f   : > { %v745_v57 = vpack.c.bf16 %v695_v53, %v693_v52  ;;  %v579_v58 = vpop.f32.mrb[28].mxu0  ;;  %1210 = vperm.xlu0 %2432, %v896_v45  }
 0x120   : > { %v580_v59 = vadd.f32 %v579_v58, %v2775_v50  ;;  %v581_v60 = vpop.f32.mrb[29].mxu0 }
 0x121   : > { %v582_v61 = vadd.f32 %v581_v60, %v2777_v51  ;;  %v583_v62 = vpop.f32.mrb[30].mxu0  ;;  %1640 = vmatprep.subr.bf16.mxu0 %v745_v57  ;;  %2380 = vmatprep.subr.bf16.mxu1 %v745_v57 }
 0x122   : > { %v584_v1 = vadd.f32 %v583_v62, %v2775_v50  ;;  %v585_v2 = vpop.f32.mrb[31].mxu0  ;;  %1641 = vmatpush1.bf16.xpose.msra.mxu0 %v744_v56  ;;  %2396 = vmatpush1.bf16.xpose.msra.mxu1 %v744_v56  ;;  %v696_v4 = vmax.f32 %v580_v59, 0.0  ;;  %v898_v56 = vld [vmem:[%s3514_s4 + $0x1f0] sm:$0xff] }
 0x123   : > { %v586_v3 = vadd.f32 %v585_v2, %v2777_v51  ;;  %v697_v6 = vmax.f32 %v582_v61, 0.0  ;;  %1220 = vperm.xlu0 %2432, %v898_v56  }
 0x124   : > { %v698_v5 = vmax.f32 %v584_v1, 0.0  ;;  %v900_v1 = vld [vmem:[%s3514_s4 + $0x200] sm:$0xff] }
 0x125   : > { %v699_v7 = vmax.f32 %v586_v3, 0.0 }
 0x126   : > { %v746_v10 = vpack.c.bf16 %v698_v5, %v696_v4 }
 0x127   : > { %v747_v11 = vpack.c.bf16 %v699_v7, %v697_v6  ;;  %v589_v12 = vpop.f32.mrb[32].mxu0  ;;  %1230 = vperm.xlu0 %2432, %v900_v1  }
 0x128   : > { %v590_v13 = vadd.f32 %v589_v12, %v2775_v50  ;;  %v591_v14 = vpop.f32.mrb[33].mxu0 }
 0x129   : > { %v592_v15 = vadd.f32 %v591_v14, %v2777_v51  ;;  %v593_v16 = vpop.f32.mrb[34].mxu0  ;;  %1642 = vmatprep.subr.bf16.mxu0 %v747_v11  ;;  %2381 = vmatprep.subr.bf16.mxu1 %v747_v11 }
 0x12a   : > { %v594_v19 = vadd.f32 %v593_v16, %v2775_v50  ;;  %v595_v20 = vpop.f32.mrb[35].mxu0  ;;  %1643 = vmatpush1.bf16.xpose.msra.mxu0 %v746_v10  ;;  %2397 = vmatpush1.bf16.xpose.msra.mxu1 %v746_v10  ;;  %v700_v22 = vmax.f32 %v590_v13, 0.0  ;;  %v902_v10 = vld [vmem:[%s3514_s4 + $0x210] sm:$0xff] }
 0x12b   : > { %v596_v21 = vadd.f32 %v595_v20, %v2777_v51  ;;  %v701_v24 = vmax.f32 %v592_v15, 0.0  ;;  %1240 = vperm.xlu0 %2432, %v902_v10  }
 0x12c   : > { %v702_v23 = vmax.f32 %v594_v19, 0.0  ;;  %v904_v19 = vld [vmem:[%s3514_s4 + $0x220] sm:$0xff] }
 0x12d   : > { %v703_v25 = vmax.f32 %v596_v21, 0.0 }
 0x12e   : > { %v748_v28 = vpack.c.bf16 %v702_v23, %v700_v22 }
 0x12f   : > { %v749_v29 = vpack.c.bf16 %v703_v25, %v701_v24  ;;  %v599_v30 = vpop.f32.mrb[36].mxu0  ;;  %1250 = vperm.xlu0 %2432, %v904_v19   ;;  %v2466_v19 = vld [vmem:[%s3513_s3 + $0x124] ss:$8 sps:$4 sm:$0xff]  }
 0x130   : > { %v600_v31 = vadd.f32 %v599_v30, %v2775_v50  ;;  %v601_v32 = vpop.f32.mrb[37].mxu0 }
 0x131   : > { %v602_v33 = vadd.f32 %v601_v32, %v2777_v51  ;;  %v603_v34 = vpop.f32.mrb[38].mxu0  ;;  %1644 = vmatprep.subr.bf16.mxu0 %v749_v29  ;;  %2382 = vmatprep.subr.bf16.mxu1 %v749_v29 }
 0x132   : > { %v604_v37 = vadd.f32 %v603_v34, %v2775_v50  ;;  %v605_v38 = vpop.f32.mrb[39].mxu0  ;;  %1645 = vmatpush1.bf16.xpose.msra.mxu0 %v748_v28  ;;  %2398 = vmatpush1.bf16.xpose.msra.mxu1 %v748_v28  ;;  %v704_v40 = vmax.f32 %v600_v31, 0.0  ;;  %v906_v28 = vld [vmem:[%s3514_s4 + $0x230] sm:$0xff] }
 0x133   : > { %v606_v39 = vadd.f32 %v605_v38, %v2777_v51  ;;  %v705_v42 = vmax.f32 %v602_v33, 0.0  ;;  %1260 = vperm.xlu0 %2432, %v906_v28   ;;  %v2480_v28 = vld [vmem:[%s3513_s3 + $0x30] ss:$8 sps:$4 sm:$0xff]  }
 0x134   : > { %v706_v41 = vmax.f32 %v604_v37, 0.0 }
 0x135   : > { %v707_v43 = vmax.f32 %v606_v39, 0.0 }
 0x136   : > { %v750_v46 = vpack.c.bf16 %v706_v41, %v704_v40 }
 0x137   : > { %v751_v47 = vpack.c.bf16 %v707_v43, %v705_v42  ;;  %v609_v48 = vpop.f32.mrb[40].mxu0 }
 0x138   : > { %v610_v49 = vadd.f32 %v609_v48, %v2775_v50  ;;  %v611_v52 = vpop.f32.mrb[41].mxu0 }
 0x139   : > { %v612_v53 = vadd.f32 %v611_v52, %v2777_v51  ;;  %v613_v54 = vpop.f32.mrb[42].mxu0  ;;  %1646 = vmatprep.subr.bf16.mxu0 %v751_v47  ;;  %2383 = vmatprep.subr.bf16.mxu1 %v751_v47 }
 0x13a   : > { %v614_v57 = vadd.f32 %v613_v54, %v2775_v50  ;;  %v615_v58 = vpop.f32.mrb[43].mxu0  ;;  %1647 = vmatpush1.bf16.xpose.msra.mxu0 %v750_v46  ;;  %2399 = vmatpush1.bf16.xpose.msra.mxu1 %v750_v46  ;;  %v708_v60 = vmax.f32 %v610_v49, 0.0 }
 0x13b   : > { %v616_v59 = vadd.f32 %v615_v58, %v2777_v51  ;;  %v709_v62 = vmax.f32 %v612_v53, 0.0 }
 0x13c   : > { %v710_v61 = vmax.f32 %v614_v57, 0.0 }
 0x13d   : > { %v711_v63 = vmax.f32 %v616_v59, 0.0 }
 0x13e   : > { %v752_v2 = vpack.c.bf16 %v710_v61, %v708_v60 }
 0x13f   : > { %v753_v3 = vpack.c.bf16 %v711_v63, %v709_v62  ;;  %v619_v4 = vpop.f32.mrb[44].mxu0 }
 0x140   : > { %v620_v5 = vadd.f32 %v619_v4, %v2775_v50  ;;  %v621_v6 = vpop.f32.mrb[45].mxu0 }
 0x141   : > { %v622_v7 = vadd.f32 %v621_v6, %v2777_v51  ;;  %v623_v8 = vpop.f32.mrb[46].mxu0  ;;  %1648 = vmatprep.subr.bf16.mxu0 %v753_v3  ;;  %2384 = vmatprep.subr.bf16.mxu1 %v753_v3 }
 0x142   : > { %v624_v11 = vadd.f32 %v623_v8, %v2775_v50  ;;  %v625_v12 = vpop.f32.mrb[47].mxu0  ;;  %1649 = vmatpush1.bf16.xpose.msra.mxu0 %v752_v2  ;;  %2400 = vmatpush1.bf16.xpose.msra.mxu1 %v752_v2  ;;  %v712_v14 = vmax.f32 %v620_v5, 0.0 }
 0x143   : > { %v626_v13 = vadd.f32 %v625_v12, %v2777_v51  ;;  %v713_v16 = vmax.f32 %v622_v7, 0.0 }
 0x144   : > { %v714_v15 = vmax.f32 %v624_v11, 0.0 }
 0x145   : > { %v715_v17 = vmax.f32 %v626_v13, 0.0 }
 0x146   : > { %v754_v20 = vpack.c.bf16 %v714_v15, %v712_v14 }
 0x147   : > { %v755_v21 = vpack.c.bf16 %v715_v17, %v713_v16  ;;  %v629_v22 = vpop.f32.mrb[48].mxu0 }
 0x148   : > { %v630_v23 = vadd.f32 %v629_v22, %v2775_v50  ;;  %v631_v24 = vpop.f32.mrb[49].mxu0  ;;  %v2470_v22 = vld [vmem:[%s3513_s3 + $0x24] ss:$8 sps:$4 sm:$0xff]  }
 0x149   : > { %v632_v25 = vadd.f32 %v631_v24, %v2777_v51  ;;  %v633_v26 = vpop.f32.mrb[50].mxu0  ;;  %1650 = vmatprep.subr.bf16.mxu0 %v755_v21  ;;  %2385 = vmatprep.subr.bf16.mxu1 %v755_v21  ;;  %v2469_v21 = vld [vmem:[%s3513_s3 + $0x120] ss:$8 sps:$4 sm:$0xff]  }
 0x14a   : > { %v634_v29 = vadd.f32 %v633_v26, %v2775_v50  ;;  %v635_v30 = vpop.f32.mrb[51].mxu0  ;;  %1651 = vmatpush1.bf16.xpose.msra.mxu0 %v754_v20  ;;  %2401 = vmatpush1.bf16.xpose.msra.mxu1 %v754_v20  ;;  %v716_v32 = vmax.f32 %v630_v23, 0.0  ;;  %v2468_v20 = vld [vmem:[%s3513_s3 + $0x10] ss:$8 sps:$4 sm:$0xff]   ;;  %v2472_v23 = vld [vmem:[%s3513_s3 + $0x134] ss:$8 sps:$4 sm:$0xff]  }
 0x14b   : > { %v636_v31 = vadd.f32 %v635_v30, %v2777_v51  ;;  %v717_v34 = vmax.f32 %v632_v25, 0.0  ;;  %v2474_v24 = vld [vmem:[%s3513_s3 + $0x20] ss:$8 sps:$4 sm:$0xff]   ;;  %v2475_v25 = vld [vmem:[%s3513_s3 + $0x130] ss:$8 sps:$4 sm:$0xff]  }
 0x14c   : > { %v718_v33 = vmax.f32 %v634_v29, 0.0  ;;  %v2476_v26 = vld [vmem:[%s3513_s3 + $0x34] ss:$8 sps:$4 sm:$0xff]   ;;  %v2481_v29 = vld [vmem:[%s3513_s3 + $0x140] ss:$8 sps:$4 sm:$0xff]  }
 0x14d   : > { %v719_v35 = vmax.f32 %v636_v31, 0.0  ;;  %v2482_v30 = vld [vmem:[%s3513_s3 + $0x44] ss:$8 sps:$4 sm:$0xff]   ;;  %v2484_v31 = vld [vmem:[%s3513_s3 + $0x154] ss:$8 sps:$4 sm:$0xff]  }
 0x14e   : > { %v756_v36 = vpack.c.bf16 %v718_v33, %v716_v32  ;;  %v2486_v32 = vld [vmem:[%s3513_s3 + $0x40] ss:$8 sps:$4 sm:$0xff]   ;;  %v2487_v33 = vld [vmem:[%s3513_s3 + $0x150] ss:$8 sps:$4 sm:$0xff]  }
 0x14f   : > { %v757_v37 = vpack.c.bf16 %v719_v35, %v717_v34  ;;  %v639_v38 = vpop.f32.mrb[52].mxu0  ;;  %v2488_v34 = vld [vmem:[%s3513_s3 + $0x54] ss:$8 sps:$4 sm:$0xff]   ;;  %v2490_v35 = vld [vmem:[%s3513_s3 + $0x164] ss:$8 sps:$4 sm:$0xff]  }
 0x150   : > { %v640_v39 = vadd.f32 %v639_v38, %v2775_v50  ;;  %v641_v40 = vpop.f32.mrb[53].mxu0  ;;  %v2494_v38 = vld [vmem:[%s3513_s3 + $0x64] ss:$8 sps:$4 sm:$0xff]  }
 0x151   : > { %v642_v41 = vadd.f32 %v641_v40, %v2777_v51  ;;  %v643_v42 = vpop.f32.mrb[54].mxu0  ;;  %1652 = vmatprep.subr.bf16.mxu0 %v757_v37  ;;  %2386 = vmatprep.subr.bf16.mxu1 %v757_v37  ;;  %v2493_v37 = vld [vmem:[%s3513_s3 + $0x160] ss:$8 sps:$4 sm:$0xff]  }
 0x152   : > { %v644_v43 = vadd.f32 %v643_v42, %v2775_v50  ;;  %v645_v44 = vpop.f32.mrb[55].mxu0  ;;  %1653 = vmatpush1.bf16.xpose.msra.mxu0 %v756_v36  ;;  %2402 = vmatpush1.bf16.xpose.msra.mxu1 %v756_v36  ;;  %v720_v46 = vmax.f32 %v640_v39, 0.0  ;;  %v2492_v36 = vld [vmem:[%s3513_s3 + $0x50] ss:$8 sps:$4 sm:$0xff]   ;;  %v2496_v39 = vld [vmem:[%s3513_s3 + $0x174] ss:$8 sps:$4 sm:$0xff]  }
 0x153   : > { %v646_v45 = vadd.f32 %v645_v44, %v2777_v51  ;;  %v721_v48 = vmax.f32 %v642_v41, 0.0  ;;  %v2498_v40 = vld [vmem:[%s3513_s3 + $0x60] ss:$8 sps:$4 sm:$0xff]   ;;  %v2499_v41 = vld [vmem:[%s3513_s3 + $0x170] ss:$8 sps:$4 sm:$0xff]  }
 0x154   : > { %v722_v47 = vmax.f32 %v644_v43, 0.0  ;;  %v2500_v42 = vld [vmem:[%s3513_s3 + $0x74] ss:$8 sps:$4 sm:$0xff]   ;;  %v2502_v43 = vld [vmem:[%s3513_s3 + $0x184] ss:$8 sps:$4 sm:$0xff]  }
 0x155   : > { %v723_v49 = vmax.f32 %v646_v45, 0.0  ;;  %v2504_v44 = vld [vmem:[%s3513_s3 + $0x70] ss:$8 sps:$4 sm:$0xff]   ;;  %v2505_v45 = vld [vmem:[%s3513_s3 + $0x180] ss:$8 sps:$4 sm:$0xff]  }
 0x156   : > { %v758_v52 = vpack.c.bf16 %v722_v47, %v720_v46  ;;  %v2506_v46 = vld [vmem:[%s3513_s3 + $0x84] ss:$8 sps:$4 sm:$0xff]   ;;  %v2508_v47 = vld [vmem:[%s3513_s3 + $0x194] ss:$8 sps:$4 sm:$0xff]  }
 0x157   : > { %v759_v53 = vpack.c.bf16 %v723_v49, %v721_v48  ;;  %v649_v54 = vpop.f32.mrb[56].mxu0  ;;  %v2510_v48 = vld [vmem:[%s3513_s3 + $0x80] ss:$8 sps:$4 sm:$0xff]   ;;  %v2511_v49 = vld [vmem:[%s3513_s3 + $0x190] ss:$8 sps:$4 sm:$0xff]  }
 0x158   : > { %v650_v55 = vadd.f32 %v649_v54, %v2775_v50  ;;  %v651_v56 = vpop.f32.mrb[57].mxu0  ;;  %v2516_v54 = vld [vmem:[%s3513_s3 + $0x90] ss:$8 sps:$4 sm:$0xff]  }
 0x159   : > { %v652_v57 = vadd.f32 %v651_v56, %v2777_v51  ;;  %v653_v58 = vpop.f32.mrb[58].mxu0  ;;  %1654 = vmatprep.subr.bf16.mxu0 %v759_v53  ;;  %2387 = vmatprep.subr.bf16.mxu1 %v759_v53  ;;  %v2514_v53 = vld [vmem:[%s3513_s3 + $0x1a4] ss:$8 sps:$4 sm:$0xff]  }
 0x15a   : > { %v654_v59 = vadd.f32 %v653_v58, %v2775_v50  ;;  %v655_v60 = vpop.f32.mrb[59].mxu0  ;;  %1655 = vmatpush1.bf16.xpose.msra.mxu0 %v758_v52  ;;  %2403 = vmatpush1.bf16.xpose.msra.mxu1 %v758_v52  ;;  %v724_v62 = vmax.f32 %v650_v55, 0.0  ;;  %v2512_v52 = vld [vmem:[%s3513_s3 + $0x94] ss:$8 sps:$4 sm:$0xff]   ;;  %v2517_v55 = vld [vmem:[%s3513_s3 + $0x1a0] ss:$8 sps:$4 sm:$0xff]  }
 0x15b   : > { %v656_v61 = vadd.f32 %v655_v60, %v2777_v51  ;;  %v725_v0 = vmax.f32 %v652_v57, 0.0  ;;  %v2518_v56 = vld [vmem:[%s3513_s3 + $0xa4] ss:$8 sps:$4 sm:$0xff]   ;;  %v2520_v57 = vld [vmem:[%s3513_s3 + $0x1b4] ss:$8 sps:$4 sm:$0xff]  }
 0x15c   : > { %v726_v63 = vmax.f32 %v654_v59, 0.0  ;;  %v2522_v58 = vld [vmem:[%s3513_s3 + $0xa0] ss:$8 sps:$4 sm:$0xff]   ;;  %v2523_v59 = vld [vmem:[%s3513_s3 + $0x1b0] ss:$8 sps:$4 sm:$0xff]  }
 0x15d   : > { %v727_v1 = vmax.f32 %v656_v61, 0.0  ;;  %v2524_v60 = vld [vmem:[%s3513_s3 + $0xb4] ss:$8 sps:$4 sm:$0xff]   ;;  %v2526_v61 = vld [vmem:[%s3513_s3 + $0x1c4] ss:$8 sps:$4 sm:$0xff]  }
 0x15e   : > { %v760_v2 = vpack.c.bf16 %v726_v63, %v724_v62  ;;  %v2528_v62 = vld [vmem:[%s3513_s3 + $0xb0] ss:$8 sps:$4 sm:$0xff]   ;;  %v2529_v63 = vld [vmem:[%s3513_s3 + $0x1c0] ss:$8 sps:$4 sm:$0xff]  }
 0x15f   : > { %v761_v3 = vpack.c.bf16 %v727_v1, %v725_v0  ;;  %v659_v4 = vpop.f32.mrb[60].mxu0  ;;  %v2530_v0 = vld [vmem:[%s3513_s3 + $0xc4] ss:$8 sps:$4 sm:$0xff]   ;;  %v2532_v1 = vld [vmem:[%s3513_s3 + $0x1d4] ss:$8 sps:$4 sm:$0xff]  }
 0x160   : > { %v660_v5 = vadd.f32 %v659_v4, %v2775_v50  ;;  %v661_v6 = vpop.f32.mrb[61].mxu0  ;;  %v2536_v4 = vld [vmem:[%s3513_s3 + $0xd4] ss:$8 sps:$4 sm:$0xff]  }
 0x161   : > { %v662_v7 = vadd.f32 %v661_v6, %v2777_v51  ;;  %v663_v8 = vpop.f32.mrb[62].mxu0  ;;  %1656 = vmatprep.subr.bf16.mxu0 %v761_v3  ;;  %2388 = vmatprep.subr.bf16.mxu1 %v761_v3  ;;  %v2535_v3 = vld [vmem:[%s3513_s3 + $0x1d0] ss:$8 sps:$4 sm:$0xff]  }
 0x162   : > { %v664_v9 = vadd.f32 %v663_v8, %v2775_v50  ;;  %v665_v10 = vpop.f32.mrb[63].mxu0  ;;  %1657 = vmatpush1.bf16.xpose.msra.mxu0 %v760_v2  ;;  %2404 = vmatpush1.bf16.xpose.msra.mxu1 %v760_v2  ;;  %v728_v12 = vmax.f32 %v660_v5, 0.0  ;;  %v2461_v50 = vld [vmem:[%s3513_s3] ss:$8 sps:$4 sm:$0xff]   ;;  %v2538_v5 = vld [vmem:[%s3513_s3 + $0x1e4] ss:$8 sps:$4 sm:$0xff]  }
 0x163   : > { %v666_v11 = vadd.f32 %v665_v10, %v2777_v51  ;;  %v729_v14 = vmax.f32 %v662_v7, 0.0  ;;  %v2464_v51 = vld [vmem:[%s3513_s3 + $0x14] ss:$8 sps:$4 sm:$0xff]   ;;  %v2534_v2 = vld [vmem:[%s3513_s3 + $0xc0] ss:$8 sps:$4 sm:$0xff]   ;;  %v3173_v10 = vpop.permute.xlu1 %920 }
 0x164   : > { %v730_v13 = vmax.f32 %v664_v9, 0.0  ;;  %v2540_v6 = vld [vmem:[%s3513_s3 + $0xd0] ss:$8 sps:$4 sm:$0xff]   ;;  %v2541_v7 = vld [vmem:[%s3513_s3 + $0x1e0] ss:$8 sps:$4 sm:$0xff]  }
 0x165   : > { %v731_v15 = vmax.f32 %v666_v11, 0.0  ;;  %v2542_v8 = vld [vmem:[%s3513_s3 + $0xe4] ss:$8 sps:$4 sm:$0xff]   ;;  %v2544_v9 = vld [vmem:[%s3513_s3 + $0x1f4] ss:$8 sps:$4 sm:$0xff]   ;;  %v3175_v11 = vpop.permute.xlu0 %910 }
 0x166   : > { %v762_v16 = vpack.c.bf16 %v730_v13, %v728_v12  ;;  %v2546_v12 = vld [vmem:[%s3513_s3 + $0xe0] ss:$8 sps:$4 sm:$0xff]   ;;  %v2547_v13 = vld [vmem:[%s3513_s3 + $0x1f0] ss:$8 sps:$4 sm:$0xff]  }
 0x167   : > { %v763_v17 = vpack.c.bf16 %v731_v15, %v729_v14  ;;  %v2548_v14 = vld [vmem:[%s3513_s3 + $0xf4] ss:$8 sps:$4 sm:$0xff]   ;;  %v2550_v15 = vld [vmem:[%s3513_s3 + $0x204] ss:$8 sps:$4 sm:$0xff]  }
 0x169   : > { %1658 = vmatprep.subr.bf16.mxu0 %v763_v17  ;;  %2389 = vmatprep.subr.bf16.mxu1 %v763_v17  ;;  %v3191_v17 = vpop.permute.xlu0 %915 }
 0x16a   : > { %1659 = vmatpush1.bf16.xpose.msra.mxu0 %v762_v16  ;;  %2405 = vmatpush1.bf16.xpose.msra.mxu1 %v762_v16  ;;  %v3189_v16 = vpop.permute.xlu1 %925 }
 0x171   : > { %1661 = vmatmul.mubr.bf16.vlgmr.msra.gmra.mrb[64].mxu0 %v2461_v50  ;;  %1831 = vmatmul.mubr.bf16.vlgmr.msra.gmra.mrb[0].mxu1 %v2458_v18  ;;  %v2552_v18 = vld [vmem:[%s3513_s3 + $0xf0] ss:$8 sps:$4 sm:$0xff]   ;;  %v2553_v50 = vld [vmem:[%s3513_s3 + $0x200] ss:$8 sps:$4 sm:$0xff]  }
 0x172   : > { %1670 = vmatprep.mubr.bf16.mxu0 %v2464_v51  ;;  %1840 = vmatprep.mubr.bf16.mxu1 %v2466_v19  ;;  %v2554_v51 = vld [vmem:[%s3513_s3 + $0x104] ss:$8 sps:$4 sm:$0xff]   ;;  %v2556_v19 = vld [vmem:[%s3513_s3 + $0x214] ss:$8 sps:$4 sm:$0xff]  }
 0x179   : > { %1671 = vmatmul.mubr.bf16.gmra.mrb[68].mxu0 %v2468_v20  ;;  %1841 = vmatmul.mubr.bf16.gmra.mrb[4].mxu1 %v2469_v21  ;;  %v3205_v20 = vpop.permute.xlu1 %935  ;;  %v3207_v21 = vpop.permute.xlu0 %930 }
 0x17a   : > { %1680 = vmatprep.mubr.bf16.mxu0 %v2470_v22  ;;  %1850 = vmatprep.mubr.bf16.mxu1 %v2472_v23  ;;  %v2558_v22 = vld [vmem:[%s3513_s3 + $0x100] ss:$8 sps:$4 sm:$0xff]   ;;  %v2559_v23 = vld [vmem:[%s3513_s3 + $0x210] ss:$8 sps:$4 sm:$0xff]  }
 0x181   : > { %1681 = vmatmul.mubr.bf16.gmra.mrb[72].mxu0 %v2474_v24  ;;  %1851 = vmatmul.mubr.bf16.gmra.mrb[8].mxu1 %v2475_v25  ;;  %v2560_v24 = vld [vmem:[%s3513_s3 + $0x224] ss:$8 sps:$4 sm:$0xff]   ;;  %v3218_v25 = vpop.permute.xlu1 %945 }
 0x182   : > { %1690 = vmatprep.mubr.bf16.mxu0 %v2476_v26  ;;  %1860 = vmatprep.mubr.bf16.mxu1 %v2478_v27  ;;  %v3220_v26 = vpop.permute.xlu0 %940 }
 0x185   : > { %v3222_v27 = vpop.permute.xlu1 %955 }
 0x189   : > { %1691 = vmatmul.mubr.bf16.gmra.mrb[76].mxu0 %v2480_v28  ;;  %1861 = vmatmul.mubr.bf16.gmra.mrb[12].mxu1 %v2481_v29  ;;  %v3224_v28 = vpop.permute.xlu0 %950  ;;  %v2562_v29 = vld [vmem:[%s3513_s3 + $0x220] ss:$8 sps:$4 sm:$0xff]  }
 0x18a   : > { %1700 = vmatprep.mubr.bf16.mxu0 %v2482_v30  ;;  %1870 = vmatprep.mubr.bf16.mxu1 %v2484_v31  ;;  %v2563_v30 = vld [vmem:[%s3513_s3 + $0x234] ss:$8 sps:$4 sm:$0xff]   ;;  %v3232_v31 = vpop.permute.xlu1 %965 }
 0x191   : > { %1701 = vmatmul.mubr.bf16.gmra.mrb[80].mxu0 %v2486_v32  ;;  %1871 = vmatmul.mubr.bf16.gmra.mrb[16].mxu1 %v2487_v33  ;;  %v3234_v32 = vpop.permute.xlu0 %960  ;;  %v2565_v33 = vld [vmem:[%s3513_s3 + $0x230] ss:$8 sps:$4 sm:$0xff]  }
 0x192   : > { %1710 = vmatprep.mubr.bf16.mxu0 %v2488_v34  ;;  %1880 = vmatprep.mubr.bf16.mxu1 %v2490_v35  ;;  %v3239_v34 = vpop.permute.xlu1 %975 }
 0x195   : > { %v3241_v35 = vpop.permute.xlu0 %970 }
 0x199   : > { %1711 = vmatmul.mubr.bf16.gmra.mrb[84].mxu0 %v2492_v36  ;;  %1881 = vmatmul.mubr.bf16.gmra.mrb[20].mxu1 %v2493_v37  ;;  %v3243_v36 = vpop.permute.xlu1 %985  ;;  %v3245_v37 = vpop.permute.xlu0 %980 }
 0x19a   : > { %1720 = vmatprep.mubr.bf16.mxu0 %v2494_v38  ;;  %1890 = vmatprep.mubr.bf16.mxu1 %v2496_v39 }
 0x19d   : > { %v3247_v38 = vpop.permute.xlu1 %995  ;;  %v3249_v39 = vpop.permute.xlu0 %990 }
 0x1a1   : > { %1721 = vmatmul.mubr.bf16.gmra.mrb[88].mxu0 %v2498_v40  ;;  %1891 = vmatmul.mubr.bf16.gmra.mrb[24].mxu1 %v2499_v41  ;;  %v3251_v40 = vpop.permute.xlu1 %1005  ;;  %v3253_v41 = vpop.permute.xlu0 %1000 }
 0x1a2   : > { %1730 = vmatprep.mubr.bf16.mxu0 %v2500_v42  ;;  %1900 = vmatprep.mubr.bf16.mxu1 %v2502_v43 }
 0x1a5   : > { %v3255_v42 = vpop.permute.xlu1 %1015  ;;  %v3257_v43 = vpop.permute.xlu0 %1010 }
 0x1a9   : > { %1731 = vmatmul.mubr.bf16.gmra.mrb[92].mxu0 %v2504_v44  ;;  %1901 = vmatmul.mubr.bf16.gmra.mrb[28].mxu1 %v2505_v45  ;;  %v3259_v44 = vpop.permute.xlu1 %1025  ;;  %v3261_v45 = vpop.permute.xlu0 %1020 }
 0x1aa   : > { %1740 = vmatprep.mubr.bf16.mxu0 %v2506_v46  ;;  %1910 = vmatprep.mubr.bf16.mxu1 %v2508_v47 }
 0x1ad   : > { %v3263_v46 = vpop.permute.xlu1 %1035  ;;  %v3265_v47 = vpop.permute.xlu0 %1030 }
 0x1b1   : > { %1741 = vmatmul.mubr.bf16.gmra.mrb[96].mxu0 %v2510_v48  ;;  %1911 = vmatmul.mubr.bf16.gmra.mrb[32].mxu1 %v2511_v49  ;;  %v3267_v48 = vpop.permute.xlu1 %1045  ;;  %v3269_v49 = vpop.permute.xlu0 %1040 }
 0x1b2   : > { %1750 = vmatprep.mubr.bf16.mxu0 %v2512_v52  ;;  %1920 = vmatprep.mubr.bf16.mxu1 %v2514_v53 }
 0x1b5   : > { %v3271_v52 = vpop.permute.xlu1 %1055  ;;  %v3273_v53 = vpop.permute.xlu0 %1050 }
 0x1b9   : > { %1751 = vmatmul.mubr.bf16.gmra.mrb[100].mxu0 %v2516_v54  ;;  %1921 = vmatmul.mubr.bf16.gmra.mrb[36].mxu1 %v2517_v55  ;;  %v3275_v54 = vpop.permute.xlu1 %1065  ;;  %v3277_v55 = vpop.permute.xlu0 %1060 }
 0x1ba   : > { %1760 = vmatprep.mubr.bf16.mxu0 %v2518_v56  ;;  %1930 = vmatprep.mubr.bf16.mxu1 %v2520_v57 }
 0x1bd   : > { %v3279_v56 = vpop.permute.xlu1 %1075  ;;  %v3281_v57 = vpop.permute.xlu0 %1070 }
 0x1c1   : > { %1761 = vmatmul.mubr.bf16.gmra.mrb[104].mxu0 %v2522_v58  ;;  %1931 = vmatmul.mubr.bf16.gmra.mrb[40].mxu1 %v2523_v59  ;;  %v1086_v58 = vpop.permute.xlu1 %1085  ;;  %v1081_v59 = vpop.permute.xlu0 %1080 }
 0x1c2   : > { %1770 = vmatprep.mubr.bf16.mxu0 %v2524_v60  ;;  %1940 = vmatprep.mubr.bf16.mxu1 %v2526_v61 }
 0x1c9   : > { %1771 = vmatmul.mubr.bf16.gmra.mrb[108].mxu0 %v2528_v62  ;;  %1941 = vmatmul.mubr.bf16.gmra.mrb[44].mxu1 %v2529_v63 }
 0x1ca   : > { %1780 = vmatprep.mubr.bf16.mxu0 %v2530_v0  ;;  %1950 = vmatprep.mubr.bf16.mxu1 %v2532_v1 }
 0x1d1   : > { %1781 = vmatmul.mubr.bf16.gmra.mrb[112].mxu0 %v2534_v2  ;;  %1951 = vmatmul.mubr.bf16.gmra.mrb[48].mxu1 %v2535_v3 }
 0x1d2   : > { %1790 = vmatprep.mubr.bf16.mxu0 %v2536_v4  ;;  %1960 = vmatprep.mubr.bf16.mxu1 %v2538_v5 }
 0x1d9   : > { %1791 = vmatmul.mubr.bf16.gmra.mrb[116].mxu0 %v2540_v6  ;;  %1961 = vmatmul.mubr.bf16.gmra.mrb[52].mxu1 %v2541_v7 }
 0x1da   : > { %1800 = vmatprep.mubr.bf16.mxu0 %v2542_v8  ;;  %1970 = vmatprep.mubr.bf16.mxu1 %v2544_v9 }
 0x1e1   : > { %1801 = vmatmul.mubr.bf16.gmra.mrb[120].mxu0 %v2546_v12  ;;  %1971 = vmatmul.mubr.bf16.gmra.mrb[56].mxu1 %v2547_v13 }
 0x1e2   : > { %1810 = vmatprep.mubr.bf16.mxu0 %v2548_v14  ;;  %1980 = vmatprep.mubr.bf16.mxu1 %v2550_v15  ;;  %v1091_v14 = vpop.permute.xlu0 %1090 }
 0x1e9   : > { %1811 = vmatmul.mubr.bf16.gmra.mrb[124].mxu0 %v2552_v18  ;;  %1981 = vmatmul.mubr.bf16.gmra.mrb[60].mxu1 %v2553_v50 }
 0x1ea   : > { %1820 = vmatprep.mubr.bf16.mxu0 %v2554_v51  ;;  %1990 = vmatprep.mubr.bf16.mxu1 %v2556_v19 }
 0x1f1   : > { %1821 = vmatmul.mubr.bf16.gmra.mrb[128].mxu0 %v2558_v22  ;;  %1991 = vmatmul.mubr.bf16.gmra.mrb[64].mxu1 %v2559_v23 }
 0x1f2   : > { %2000 = vmatprep.mubr.bf16.mxu1 %v2560_v24 }
 0x1f9   : > { %2001 = vmatmul.mubr.bf16.gmra.mrb[68].mxu1 %v2562_v29 }
 0x1fa   : > { %2010 = vmatprep.mubr.bf16.mxu1 %v2563_v30 }
 0x201   : > { %2011 = vmatmul.mubr.bf16.gmra.mrb[72].mxu1 %v2565_v33 }
 0x244   : > { %v1832_v60 = vpop.f32.mrb[0].mxu1  ;;  %v1662_v61 = vpop.f32.mrb[64].mxu0 }
 0x245   : > { %v1833_v62 = vadd.f32 %v1832_v60, %v1081_v59  ;;  %v1834_v63 = vpop.f32.mrb[1].mxu1  ;;  %v1663_v0 = vadd.f32 %v1662_v61, %v3175_v11  ;;  %v1664_v1 = vpop.f32.mrb[65].mxu0 }
 0x246   : > { %v1835_v2 = vadd.f32 %v1834_v63, %v1081_v59  ;;  %v1836_v3 = vpop.f32.mrb[2].mxu1  ;;  %v1665_v4 = vadd.f32 %v1664_v1, %v3175_v11  ;;  %v1666_v5 = vpop.f32.mrb[66].mxu0 }
 0x247   : > { %2089 = vst [vmem:[%s3287_s10 + $0x220] sm:$0xff] %v1833_v62  ;;  %v1837_v6 = vadd.f32 %v1836_v3, %v1086_v58  ;;  %v1838_v7 = vpop.f32.mrb[3].mxu1  ;;  %2021 = vst [vmem:[%s3287_s10] sm:$0xff] %v1663_v0  ;;  %v1667_v8 = vadd.f32 %v1666_v5, %v3191_v17  ;;  %v1668_v9 = vpop.f32.mrb[67].mxu0 }
 0x248   : > { %2090 = vst [vmem:[%s3287_s10 + $0x228] sm:$0xff] %v1835_v2  ;;  %v1839_v12 = vadd.f32 %v1838_v7, %v1086_v58  ;;  %2022 = vst [vmem:[%s3287_s10 + $0x8] sm:$0xff] %v1665_v4  ;;  %v1669_v13 = vadd.f32 %v1668_v9, %v3191_v17  ;;  %v1096_v11 = vpop.permute.xlu1 %1095  ;;  %v1101_v62 = vpop.permute.xlu0 %1100 }
 0x249   : > { %2091 = vst [vmem:[%s3287_s10 + $0x230] sm:$0xff] %v1837_v6  ;;  %2023 = vst [vmem:[%s3287_s10 + $0x10] sm:$0xff] %v1667_v8 }
 0x24a   : > { %2092 = vst [vmem:[%s3287_s10 + $0x238] sm:$0xff] %v1839_v12  ;;  %2024 = vst [vmem:[%s3287_s10 + $0x18] sm:$0xff] %v1669_v13 }
 0x24c   : > { %v1672_v15 = vpop.f32.mrb[68].mxu0  ;;  %v1842_v18 = vpop.f32.mrb[4].mxu1 }
 0x24d   : > { %v1673_v50 = vadd.f32 %v1672_v15, %v3173_v10  ;;  %v1843_v51 = vadd.f32 %v1842_v18, %v1091_v14  ;;  %v1674_v19 = vpop.f32.mrb[69].mxu0  ;;  %v1844_v22 = vpop.f32.mrb[5].mxu1 }
 0x24e   : > { %v1675_v17 = vadd.f32 %v1674_v19, %v3173_v10  ;;  %v1845_v23 = vadd.f32 %v1844_v22, %v1091_v14  ;;  %v1676_v24 = vpop.f32.mrb[70].mxu0  ;;  %v1846_v29 = vpop.f32.mrb[6].mxu1 }
 0x24f   : > { %2025 = vst [vmem:[%s3287_s10 + $0x20] sm:$0xff] %v1673_v50  ;;  %2093 = vst [vmem:[%s3287_s10 + $0x240] sm:$0xff] %v1843_v51  ;;  %v1677_v30 = vadd.f32 %v1676_v24, %v3189_v16  ;;  %v1847_v33 = vadd.f32 %v1846_v29, %v1096_v11  ;;  %v1678_v58 = vpop.f32.mrb[71].mxu0  ;;  %v1848_v59 = vpop.f32.mrb[7].mxu1 }
 0x250   : > { %2026 = vst [vmem:[%s3287_s10 + $0x28] sm:$0xff] %v1675_v17  ;;  %2094 = vst [vmem:[%s3287_s10 + $0x248] sm:$0xff] %v1845_v23  ;;  %v1679_v60 = vadd.f32 %v1678_v58, %v3189_v16  ;;  %v1849_v61 = vadd.f32 %v1848_v59, %v1096_v11  ;;  %v1106_v10 = vpop.permute.xlu1 %1105  ;;  %v1111_v15 = vpop.permute.xlu0 %1110 }
 0x251   : > { %2027 = vst [vmem:[%s3287_s10 + $0x30] sm:$0xff] %v1677_v30  ;;  %2095 = vst [vmem:[%s3287_s10 + $0x250] sm:$0xff] %v1847_v33 }
 0x252   : > { %2028 = vst [vmem:[%s3287_s10 + $0x38] sm:$0xff] %v1679_v60  ;;  %2096 = vst [vmem:[%s3287_s10 + $0x258] sm:$0xff] %v1849_v61 }
 0x254   : > { %v1682_v63 = vpop.f32.mrb[72].mxu0  ;;  %v1852_v0 = vpop.f32.mrb[8].mxu1 }
 0x255   : > { %v1683_v1 = vadd.f32 %v1682_v63, %v3207_v21  ;;  %v1853_v2 = vadd.f32 %v1852_v0, %v1101_v62  ;;  %v1684_v3 = vpop.f32.mrb[73].mxu0  ;;  %v1854_v4 = vpop.f32.mrb[9].mxu1 }
 0x256   : > { %v1685_v16 = vadd.f32 %v1684_v3, %v3207_v21  ;;  %v1855_v5 = vadd.f32 %v1854_v4, %v1101_v62  ;;  %v1686_v6 = vpop.f32.mrb[74].mxu0  ;;  %v1856_v7 = vpop.f32.mrb[10].mxu1 }
 0x257   : > { %2029 = vst [vmem:[%s3287_s10 + $0x40] sm:$0xff] %v1683_v1  ;;  %2097 = vst [vmem:[%s3287_s10 + $0x260] sm:$0xff] %v1853_v2  ;;  %v1687_v8 = vadd.f32 %v1686_v6, %v3205_v20  ;;  %v1857_v9 = vadd.f32 %v1856_v7, %v1106_v10  ;;  %v1688_v12 = vpop.f32.mrb[75].mxu0  ;;  %v1858_v13 = vpop.f32.mrb[11].mxu1 }
 0x258   : > { %2030 = vst [vmem:[%s3287_s10 + $0x48] sm:$0xff] %v1685_v16  ;;  %2098 = vst [vmem:[%s3287_s10 + $0x268] sm:$0xff] %v1855_v5  ;;  %v1689_v11 = vadd.f32 %v1688_v12, %v3205_v20  ;;  %v1859_v14 = vadd.f32 %v1858_v13, %v1106_v10  ;;  %v1116_v21 = vpop.permute.xlu1 %1115  ;;  %v1121_v10 = vpop.permute.xlu0 %1120 }
 0x259   : > { %2031 = vst [vmem:[%s3287_s10 + $0x50] sm:$0xff] %v1687_v8  ;;  %2099 = vst [vmem:[%s3287_s10 + $0x270] sm:$0xff] %v1857_v9 }
 0x25a   : > { %2032 = vst [vmem:[%s3287_s10 + $0x58] sm:$0xff] %v1689_v11  ;;  %2100 = vst [vmem:[%s3287_s10 + $0x278] sm:$0xff] %v1859_v14 }
 0x25c   : > { %v1692_v18 = vpop.f32.mrb[76].mxu0  ;;  %v1862_v50 = vpop.f32.mrb[12].mxu1 }
 0x25d   : > { %v1693_v51 = vadd.f32 %v1692_v18, %v3220_v26  ;;  %v1863_v19 = vadd.f32 %v1862_v50, %v1111_v15  ;;  %v1694_v22 = vpop.f32.mrb[77].mxu0  ;;  %v1864_v17 = vpop.f32.mrb[13].mxu1 }
 0x25e   : > { %v1695_v20 = vadd.f32 %v1694_v22, %v3220_v26  ;;  %v1865_v23 = vadd.f32 %v1864_v17, %v1111_v15  ;;  %v1696_v24 = vpop.f32.mrb[78].mxu0  ;;  %v1866_v29 = vpop.f32.mrb[14].mxu1 }
 0x25f   : > { %2033 = vst [vmem:[%s3287_s10 + $0x60] sm:$0xff] %v1693_v51  ;;  %2101 = vst [vmem:[%s3287_s10 + $0x280] sm:$0xff] %v1863_v19  ;;  %v1697_v30 = vadd.f32 %v1696_v24, %v3218_v25  ;;  %v1867_v33 = vadd.f32 %v1866_v29, %v1116_v21  ;;  %v1698_v58 = vpop.f32.mrb[79].mxu0  ;;  %v1868_v59 = vpop.f32.mrb[15].mxu1 }
 0x260   : > { %2034 = vst [vmem:[%s3287_s10 + $0x68] sm:$0xff] %v1695_v20  ;;  %2102 = vst [vmem:[%s3287_s10 + $0x288] sm:$0xff] %v1865_v23  ;;  %v1699_v60 = vadd.f32 %v1698_v58, %v3218_v25  ;;  %v1869_v61 = vadd.f32 %v1868_v59, %v1116_v21  ;;  %v1126_v26 = vpop.permute.xlu1 %1125  ;;  %v1131_v11 = vpop.permute.xlu0 %1130 }
 0x261   : > { %2035 = vst [vmem:[%s3287_s10 + $0x70] sm:$0xff] %v1697_v30  ;;  %2103 = vst [vmem:[%s3287_s10 + $0x290] sm:$0xff] %v1867_v33 }
 0x262   : > { %2036 = vst [vmem:[%s3287_s10 + $0x78] sm:$0xff] %v1699_v60  ;;  %2104 = vst [vmem:[%s3287_s10 + $0x298] sm:$0xff] %v1869_v61 }
 0x264   : > { %v1702_v62 = vpop.f32.mrb[80].mxu0  ;;  %v1872_v63 = vpop.f32.mrb[16].mxu1 }
 0x265   : > { %v1703_v0 = vadd.f32 %v1702_v62, %v3224_v28  ;;  %v1873_v1 = vadd.f32 %v1872_v63, %v1121_v10  ;;  %v1704_v2 = vpop.f32.mrb[81].mxu0  ;;  %v1874_v3 = vpop.f32.mrb[17].mxu1 }
 0x266   : > { %v1705_v25 = vadd.f32 %v1704_v2, %v3224_v28  ;;  %v1875_v4 = vadd.f32 %v1874_v3, %v1121_v10  ;;  %v1706_v16 = vpop.f32.mrb[82].mxu0  ;;  %v1876_v5 = vpop.f32.mrb[18].mxu1 }
 0x267   : > { %2037 = vst [vmem:[%s3287_s10 + $0x80] sm:$0xff] %v1703_v0  ;;  %2105 = vst [vmem:[%s3287_s10 + $0x2a0] sm:$0xff] %v1873_v1  ;;  %v1707_v6 = vadd.f32 %v1706_v16, %v3222_v27  ;;  %v1877_v7 = vadd.f32 %v1876_v5, %v1126_v26  ;;  %v1708_v8 = vpop.f32.mrb[83].mxu0  ;;  %v1878_v9 = vpop.f32.mrb[19].mxu1 }
 0x268   : > { %2038 = vst [vmem:[%s3287_s10 + $0x88] sm:$0xff] %v1705_v25  ;;  %2106 = vst [vmem:[%s3287_s10 + $0x2a8] sm:$0xff] %v1875_v4  ;;  %v1709_v12 = vadd.f32 %v1708_v8, %v3222_v27  ;;  %v1879_v13 = vadd.f32 %v1878_v9, %v1126_v26  ;;  %v1136_v28 = vpop.permute.xlu1 %1135  ;;  %v1141_v58 = vpop.permute.xlu0 %1140 }
 0x269   : > { %2039 = vst [vmem:[%s3287_s10 + $0x90] sm:$0xff] %v1707_v6  ;;  %2107 = vst [vmem:[%s3287_s10 + $0x2b0] sm:$0xff] %v1877_v7 }
 0x26a   : > { %2040 = vst [vmem:[%s3287_s10 + $0x98] sm:$0xff] %v1709_v12  ;;  %2108 = vst [vmem:[%s3287_s10 + $0x2b8] sm:$0xff] %v1879_v13 }
 0x26c   : > { %v1712_v14 = vpop.f32.mrb[84].mxu0  ;;  %v1882_v21 = vpop.f32.mrb[20].mxu1 }
 0x26d   : > { %v1713_v15 = vadd.f32 %v1712_v14, %v3234_v32  ;;  %v1883_v18 = vadd.f32 %v1882_v21, %v1131_v11  ;;  %v1714_v50 = vpop.f32.mrb[85].mxu0  ;;  %v1884_v51 = vpop.f32.mrb[21].mxu1 }
 0x26e   : > { %v1715_v27 = vadd.f32 %v1714_v50, %v3234_v32  ;;  %v1885_v19 = vadd.f32 %v1884_v51, %v1131_v11  ;;  %v1716_v22 = vpop.f32.mrb[86].mxu0  ;;  %v1886_v17 = vpop.f32.mrb[22].mxu1 }
 0x26f   : > { %2041 = vst [vmem:[%s3287_s10 + $0xa0] sm:$0xff] %v1713_v15  ;;  %2109 = vst [vmem:[%s3287_s10 + $0x2c0] sm:$0xff] %v1883_v18  ;;  %v1717_v20 = vadd.f32 %v1716_v22, %v3232_v31  ;;  %v1887_v23 = vadd.f32 %v1886_v17, %v1136_v28  ;;  %v1718_v24 = vpop.f32.mrb[87].mxu0  ;;  %v1888_v29 = vpop.f32.mrb[23].mxu1 }
 0x270   : > { %2042 = vst [vmem:[%s3287_s10 + $0xa8] sm:$0xff] %v1715_v27  ;;  %2110 = vst [vmem:[%s3287_s10 + $0x2c8] sm:$0xff] %v1885_v19  ;;  %v1719_v30 = vadd.f32 %v1718_v24, %v3232_v31  ;;  %v1889_v33 = vadd.f32 %v1888_v29, %v1136_v28  ;;  %v1146_v32 = vpop.permute.xlu1 %1145  ;;  %v1151_v6 = vpop.permute.xlu0 %1150 }
 0x271   : > { %2043 = vst [vmem:[%s3287_s10 + $0xb0] sm:$0xff] %v1717_v20  ;;  %2111 = vst [vmem:[%s3287_s10 + $0x2d0] sm:$0xff] %v1887_v23 }
 0x272   : > { %2044 = vst [vmem:[%s3287_s10 + $0xb8] sm:$0xff] %v1719_v30  ;;  %2112 = vst [vmem:[%s3287_s10 + $0x2d8] sm:$0xff] %v1889_v33 }
 0x274   : > { %v1722_v59 = vpop.f32.mrb[88].mxu0  ;;  %v1892_v60 = vpop.f32.mrb[24].mxu1 }
 0x275   : > { %v1723_v61 = vadd.f32 %v1722_v59, %v3241_v35  ;;  %v1893_v26 = vadd.f32 %v1892_v60, %v1141_v58  ;;  %v1724_v10 = vpop.f32.mrb[89].mxu0  ;;  %v1894_v62 = vpop.f32.mrb[25].mxu1 }
 0x276   : > { %v1725_v31 = vadd.f32 %v1724_v10, %v3241_v35  ;;  %v1895_v63 = vadd.f32 %v1894_v62, %v1141_v58  ;;  %v1726_v0 = vpop.f32.mrb[90].mxu0  ;;  %v1896_v1 = vpop.f32.mrb[26].mxu1 }
 0x277   : > { %2045 = vst [vmem:[%s3287_s10 + $0xc0] sm:$0xff] %v1723_v61  ;;  %2113 = vst [vmem:[%s3287_s10 + $0x2e0] sm:$0xff] %v1893_v26  ;;  %v1727_v2 = vadd.f32 %v1726_v0, %v3239_v34  ;;  %v1897_v3 = vadd.f32 %v1896_v1, %v1146_v32  ;;  %v1728_v25 = vpop.f32.mrb[91].mxu0  ;;  %v1898_v4 = vpop.f32.mrb[27].mxu1 }
 0x278   : > { %2046 = vst [vmem:[%s3287_s10 + $0xc8] sm:$0xff] %v1725_v31  ;;  %2114 = vst [vmem:[%s3287_s10 + $0x2e8] sm:$0xff] %v1895_v63  ;;  %v1729_v16 = vadd.f32 %v1728_v25, %v3239_v34  ;;  %v1899_v5 = vadd.f32 %v1898_v4, %v1146_v32  ;;  %v1156_v35 = vpop.permute.xlu1 %1155  ;;  %v1161_v22 = vpop.permute.xlu0 %1160 }
 0x279   : > { %2047 = vst [vmem:[%s3287_s10 + $0xd0] sm:$0xff] %v1727_v2  ;;  %2115 = vst [vmem:[%s3287_s10 + $0x2f0] sm:$0xff] %v1897_v3 }
 0x27a   : > { %2048 = vst [vmem:[%s3287_s10 + $0xd8] sm:$0xff] %v1729_v16  ;;  %2116 = vst [vmem:[%s3287_s10 + $0x2f8] sm:$0xff] %v1899_v5 }
 0x27c   : > { %v1732_v7 = vpop.f32.mrb[92].mxu0  ;;  %v1902_v8 = vpop.f32.mrb[28].mxu1 }
 0x27d   : > { %v1733_v9 = vadd.f32 %v1732_v7, %v3245_v37  ;;  %v1903_v12 = vadd.f32 %v1902_v8, %v1151_v6  ;;  %v1734_v13 = vpop.f32.mrb[93].mxu0  ;;  %v1904_v28 = vpop.f32.mrb[29].mxu1 }
 0x27e   : > { %v1735_v34 = vadd.f32 %v1734_v13, %v3245_v37  ;;  %v1905_v11 = vadd.f32 %v1904_v28, %v1151_v6  ;;  %v1736_v14 = vpop.f32.mrb[94].mxu0  ;;  %v1906_v21 = vpop.f32.mrb[30].mxu1 }
 0x27f   : > { %2049 = vst [vmem:[%s3287_s10 + $0xe0] sm:$0xff] %v1733_v9  ;;  %2117 = vst [vmem:[%s3287_s10 + $0x300] sm:$0xff] %v1903_v12  ;;  %v1737_v15 = vadd.f32 %v1736_v14, %v3243_v36  ;;  %v1907_v18 = vadd.f32 %v1906_v21, %v1156_v35  ;;  %v1738_v50 = vpop.f32.mrb[95].mxu0  ;;  %v1908_v51 = vpop.f32.mrb[31].mxu1 }
 0x280   : > { %2050 = vst [vmem:[%s3287_s10 + $0xe8] sm:$0xff] %v1735_v34  ;;  %2118 = vst [vmem:[%s3287_s10 + $0x308] sm:$0xff] %v1905_v11  ;;  %v1739_v27 = vadd.f32 %v1738_v50, %v3243_v36  ;;  %v1909_v19 = vadd.f32 %v1908_v51, %v1156_v35  ;;  %v1166_v37 = vpop.permute.xlu1 %1165  ;;  %v1171_v31 = vpop.permute.xlu0 %1170 }
 0x281   : > { %2051 = vst [vmem:[%s3287_s10 + $0xf0] sm:$0xff] %v1737_v15  ;;  %2119 = vst [vmem:[%s3287_s10 + $0x310] sm:$0xff] %v1907_v18 }
 0x282   : > { %2052 = vst [vmem:[%s3287_s10 + $0xf8] sm:$0xff] %v1739_v27  ;;  %2120 = vst [vmem:[%s3287_s10 + $0x318] sm:$0xff] %v1909_v19 }
 0x284   : > { %v1742_v17 = vpop.f32.mrb[96].mxu0  ;;  %v1912_v20 = vpop.f32.mrb[32].mxu1 }
 0x285   : > { %v1743_v23 = vadd.f32 %v1742_v17, %v3249_v39  ;;  %v1913_v24 = vadd.f32 %v1912_v20, %v1161_v22  ;;  %v1744_v29 = vpop.f32.mrb[97].mxu0  ;;  %v1914_v30 = vpop.f32.mrb[33].mxu1 }
 0x286   : > { %v1745_v36 = vadd.f32 %v1744_v29, %v3249_v39  ;;  %v1915_v33 = vadd.f32 %v1914_v30, %v1161_v22  ;;  %v1746_v32 = vpop.f32.mrb[98].mxu0  ;;  %v1916_v58 = vpop.f32.mrb[34].mxu1 }
 0x287   : > { %2053 = vst [vmem:[%s3287_s10 + $0x100] sm:$0xff] %v1743_v23  ;;  %2121 = vst [vmem:[%s3287_s10 + $0x320] sm:$0xff] %v1913_v24  ;;  %v1747_v59 = vadd.f32 %v1746_v32, %v3247_v38  ;;  %v1917_v60 = vadd.f32 %v1916_v58, %v1166_v37  ;;  %v1748_v61 = vpop.f32.mrb[99].mxu0  ;;  %v1918_v26 = vpop.f32.mrb[35].mxu1 }
 0x288   : > { %2054 = vst [vmem:[%s3287_s10 + $0x108] sm:$0xff] %v1745_v36  ;;  %2122 = vst [vmem:[%s3287_s10 + $0x328] sm:$0xff] %v1915_v33  ;;  %v1749_v10 = vadd.f32 %v1748_v61, %v3247_v38  ;;  %v1919_v62 = vadd.f32 %v1918_v26, %v1166_v37  ;;  %v1176_v39 = vpop.permute.xlu1 %1175  ;;  %v1181_v13 = vpop.permute.xlu0 %1180 }
 0x289   : > { %2055 = vst [vmem:[%s3287_s10 + $0x110] sm:$0xff] %v1747_v59  ;;  %2123 = vst [vmem:[%s3287_s10 + $0x330] sm:$0xff] %v1917_v60 }
 0x28a   : > { %2056 = vst [vmem:[%s3287_s10 + $0x118] sm:$0xff] %v1749_v10  ;;  %2124 = vst [vmem:[%s3287_s10 + $0x338] sm:$0xff] %v1919_v62 }
 0x28c   : > { %v1752_v63 = vpop.f32.mrb[100].mxu0  ;;  %v1922_v0 = vpop.f32.mrb[36].mxu1 }
 0x28d   : > { %v1753_v1 = vadd.f32 %v1752_v63, %v3253_v41  ;;  %v1923_v2 = vadd.f32 %v1922_v0, %v1171_v31  ;;  %v1754_v3 = vpop.f32.mrb[101].mxu0  ;;  %v1924_v25 = vpop.f32.mrb[37].mxu1 }
 0x28e   : > { %v1755_v38 = vadd.f32 %v1754_v3, %v3253_v41  ;;  %v1925_v4 = vadd.f32 %v1924_v25, %v1171_v31  ;;  %v1756_v16 = vpop.f32.mrb[102].mxu0  ;;  %v1926_v5 = vpop.f32.mrb[38].mxu1 }
 0x28f   : > { %2057 = vst [vmem:[%s3287_s10 + $0x120] sm:$0xff] %v1753_v1  ;;  %2125 = vst [vmem:[%s3287_s10 + $0x340] sm:$0xff] %v1923_v2  ;;  %v1757_v35 = vadd.f32 %v1756_v16, %v3251_v40  ;;  %v1927_v6 = vadd.f32 %v1926_v5, %v1176_v39  ;;  %v1758_v7 = vpop.f32.mrb[103].mxu0  ;;  %v1928_v8 = vpop.f32.mrb[39].mxu1 }
 0x290   : > { %2058 = vst [vmem:[%s3287_s10 + $0x128] sm:$0xff] %v1755_v38  ;;  %2126 = vst [vmem:[%s3287_s10 + $0x348] sm:$0xff] %v1925_v4  ;;  %v1759_v9 = vadd.f32 %v1758_v7, %v3251_v40  ;;  %v1929_v12 = vadd.f32 %v1928_v8, %v1176_v39  ;;  %v1186_v41 = vpop.permute.xlu1 %1185  ;;  %v1191_v23 = vpop.permute.xlu0 %1190 }
 0x291   : > { %2059 = vst [vmem:[%s3287_s10 + $0x130] sm:$0xff] %v1757_v35  ;;  %2127 = vst [vmem:[%s3287_s10 + $0x350] sm:$0xff] %v1927_v6 }
 0x292   : > { %2060 = vst [vmem:[%s3287_s10 + $0x138] sm:$0xff] %v1759_v9  ;;  %2128 = vst [vmem:[%s3287_s10 + $0x358] sm:$0xff] %v1929_v12 }
 0x294   : > { %v1762_v28 = vpop.f32.mrb[104].mxu0  ;;  %v1932_v34 = vpop.f32.mrb[40].mxu1 }
 0x295   : > { %v1763_v11 = vadd.f32 %v1762_v28, %v3257_v43  ;;  %v1933_v14 = vadd.f32 %v1932_v34, %v1181_v13  ;;  %v1764_v21 = vpop.f32.mrb[105].mxu0  ;;  %v1934_v15 = vpop.f32.mrb[41].mxu1 }
 0x296   : > { %v1765_v40 = vadd.f32 %v1764_v21, %v3257_v43  ;;  %v1935_v18 = vadd.f32 %v1934_v15, %v1181_v13  ;;  %v1766_v50 = vpop.f32.mrb[106].mxu0  ;;  %v1936_v51 = vpop.f32.mrb[42].mxu1 }
 0x297   : > { %2061 = vst [vmem:[%s3287_s10 + $0x140] sm:$0xff] %v1763_v11  ;;  %2129 = vst [vmem:[%s3287_s10 + $0x360] sm:$0xff] %v1933_v14  ;;  %v1767_v27 = vadd.f32 %v1766_v50, %v3255_v42  ;;  %v1937_v19 = vadd.f32 %v1936_v51, %v1186_v41  ;;  %v1768_v37 = vpop.f32.mrb[107].mxu0  ;;  %v1938_v22 = vpop.f32.mrb[43].mxu1 }
 0x298   : > { %2062 = vst [vmem:[%s3287_s10 + $0x148] sm:$0xff] %v1765_v40  ;;  %2130 = vst [vmem:[%s3287_s10 + $0x368] sm:$0xff] %v1935_v18  ;;  %v1769_v17 = vadd.f32 %v1768_v37, %v3255_v42  ;;  %v1939_v20 = vadd.f32 %v1938_v22, %v1186_v41  ;;  %v1196_v43 = vpop.permute.xlu1 %1195  ;;  %v1201_v63 = vpop.permute.xlu0 %1200 }
 0x299   : > { %2063 = vst [vmem:[%s3287_s10 + $0x150] sm:$0xff] %v1767_v27  ;;  %2131 = vst [vmem:[%s3287_s10 + $0x370] sm:$0xff] %v1937_v19 }
 0x29a   : > { %2064 = vst [vmem:[%s3287_s10 + $0x158] sm:$0xff] %v1769_v17  ;;  %2132 = vst [vmem:[%s3287_s10 + $0x378] sm:$0xff] %v1939_v20 }
 0x29c   : > { %v1772_v24 = vpop.f32.mrb[108].mxu0  ;;  %v1942_v29 = vpop.f32.mrb[44].mxu1 }
 0x29d   : > { %v1773_v30 = vadd.f32 %v1772_v24, %v3261_v45  ;;  %v1943_v36 = vadd.f32 %v1942_v29, %v1191_v23  ;;  %v1774_v33 = vpop.f32.mrb[109].mxu0  ;;  %v1944_v32 = vpop.f32.mrb[45].mxu1 }
 0x29e   : > { %v1775_v42 = vadd.f32 %v1774_v33, %v3261_v45  ;;  %v1945_v58 = vadd.f32 %v1944_v32, %v1191_v23  ;;  %v1776_v59 = vpop.f32.mrb[110].mxu0  ;;  %v1946_v60 = vpop.f32.mrb[46].mxu1 }
 0x29f   : > { %2065 = vst [vmem:[%s3287_s10 + $0x160] sm:$0xff] %v1773_v30  ;;  %2133 = vst [vmem:[%s3287_s10 + $0x380] sm:$0xff] %v1943_v36  ;;  %v1777_v61 = vadd.f32 %v1776_v59, %v3259_v44  ;;  %v1947_v26 = vadd.f32 %v1946_v60, %v1196_v43  ;;  %v1778_v10 = vpop.f32.mrb[111].mxu0  ;;  %v1948_v62 = vpop.f32.mrb[47].mxu1 }
 0x2a0   : > { %2066 = vst [vmem:[%s3287_s10 + $0x168] sm:$0xff] %v1775_v42  ;;  %2134 = vst [vmem:[%s3287_s10 + $0x388] sm:$0xff] %v1945_v58  ;;  %v1779_v39 = vadd.f32 %v1778_v10, %v3259_v44  ;;  %v1949_v31 = vadd.f32 %v1948_v62, %v1196_v43  ;;  %v1206_v45 = vpop.permute.xlu1 %1205  ;;  %v1211_v41 = vpop.permute.xlu0 %1210 }
 0x2a1   : > { %2067 = vst [vmem:[%s3287_s10 + $0x170] sm:$0xff] %v1777_v61  ;;  %2135 = vst [vmem:[%s3287_s10 + $0x390] sm:$0xff] %v1947_v26 }
 0x2a2   : > { %2068 = vst [vmem:[%s3287_s10 + $0x178] sm:$0xff] %v1779_v39  ;;  %2136 = vst [vmem:[%s3287_s10 + $0x398] sm:$0xff] %v1949_v31 }
 0x2a4   : > { %v1782_v0 = vpop.f32.mrb[112].mxu0  ;;  %v1952_v1 = vpop.f32.mrb[48].mxu1 }
 0x2a5   : > { %v1783_v2 = vadd.f32 %v1782_v0, %v3265_v47  ;;  %v1953_v3 = vadd.f32 %v1952_v1, %v1201_v63  ;;  %v1784_v25 = vpop.f32.mrb[113].mxu0  ;;  %v1954_v38 = vpop.f32.mrb[49].mxu1 }
 0x2a6   : > { %v1785_v44 = vadd.f32 %v1784_v25, %v3265_v47  ;;  %v1955_v4 = vadd.f32 %v1954_v38, %v1201_v63  ;;  %v1786_v16 = vpop.f32.mrb[114].mxu0  ;;  %v1956_v5 = vpop.f32.mrb[50].mxu1 }
 0x2a7   : > { %2069 = vst [vmem:[%s3287_s10 + $0x180] sm:$0xff] %v1783_v2  ;;  %2137 = vst [vmem:[%s3287_s10 + $0x3a0] sm:$0xff] %v1953_v3  ;;  %v1787_v35 = vadd.f32 %v1786_v16, %v3263_v46  ;;  %v1957_v6 = vadd.f32 %v1956_v5, %v1206_v45  ;;  %v1788_v7 = vpop.f32.mrb[115].mxu0  ;;  %v1958_v8 = vpop.f32.mrb[51].mxu1 }
 0x2a8   : > { %2070 = vst [vmem:[%s3287_s10 + $0x188] sm:$0xff] %v1785_v44  ;;  %2138 = vst [vmem:[%s3287_s10 + $0x3a8] sm:$0xff] %v1955_v4  ;;  %v1789_v9 = vadd.f32 %v1788_v7, %v3263_v46  ;;  %v1959_v12 = vadd.f32 %v1958_v8, %v1206_v45  ;;  %v1216_v47 = vpop.permute.xlu1 %1215  ;;  %v1221_v17 = vpop.permute.xlu0 %1220 }
 0x2a9   : > { %2071 = vst [vmem:[%s3287_s10 + $0x190] sm:$0xff] %v1787_v35  ;;  %2139 = vst [vmem:[%s3287_s10 + $0x3b0] sm:$0xff] %v1957_v6 }
 0x2aa   : > { %2072 = vst [vmem:[%s3287_s10 + $0x198] sm:$0xff] %v1789_v9  ;;  %2140 = vst [vmem:[%s3287_s10 + $0x3b8] sm:$0xff] %v1959_v12 }
 0x2ac   : > { %v1792_v13 = vpop.f32.mrb[116].mxu0  ;;  %v1962_v28 = vpop.f32.mrb[52].mxu1 }
 0x2ad   : > { %v1793_v34 = vadd.f32 %v1792_v13, %v3269_v49  ;;  %v1963_v11 = vadd.f32 %v1962_v28, %v1211_v41  ;;  %v1794_v14 = vpop.f32.mrb[117].mxu0  ;;  %v1964_v21 = vpop.f32.mrb[53].mxu1 }
 0x2ae   : > { %v1795_v46 = vadd.f32 %v1794_v14, %v3269_v49  ;;  %v1965_v15 = vadd.f32 %v1964_v21, %v1211_v41  ;;  %v1796_v40 = vpop.f32.mrb[118].mxu0  ;;  %v1966_v18 = vpop.f32.mrb[54].mxu1 }
 0x2af   : > { %2073 = vst [vmem:[%s3287_s10 + $0x1a0] sm:$0xff] %v1793_v34  ;;  %2141 = vst [vmem:[%s3287_s10 + $0x3c0] sm:$0xff] %v1963_v11  ;;  %v1797_v50 = vadd.f32 %v1796_v40, %v3267_v48  ;;  %v1967_v51 = vadd.f32 %v1966_v18, %v1216_v47  ;;  %v1798_v27 = vpop.f32.mrb[119].mxu0  ;;  %v1968_v19 = vpop.f32.mrb[55].mxu1 }
 0x2b0   : > { %2074 = vst [vmem:[%s3287_s10 + $0x1a8] sm:$0xff] %v1795_v46  ;;  %2142 = vst [vmem:[%s3287_s10 + $0x3c8] sm:$0xff] %v1965_v15  ;;  %v1799_v37 = vadd.f32 %v1798_v27, %v3267_v48  ;;  %v1969_v22 = vadd.f32 %v1968_v19, %v1216_v47  ;;  %v1226_v49 = vpop.permute.xlu1 %1225  ;;  %v1231_v10 = vpop.permute.xlu0 %1230 }
 0x2b1   : > { %2075 = vst [vmem:[%s3287_s10 + $0x1b0] sm:$0xff] %v1797_v50  ;;  %2143 = vst [vmem:[%s3287_s10 + $0x3d0] sm:$0xff] %v1967_v51 }
 0x2b2   : > { %2076 = vst [vmem:[%s3287_s10 + $0x1b8] sm:$0xff] %v1799_v37  ;;  %2144 = vst [vmem:[%s3287_s10 + $0x3d8] sm:$0xff] %v1969_v22 }
 0x2b4   : > { %v1802_v20 = vpop.f32.mrb[120].mxu0  ;;  %v1972_v43 = vpop.f32.mrb[56].mxu1 }
 0x2b5   : > { %v1803_v23 = vadd.f32 %v1802_v20, %v3273_v53  ;;  %v1973_v24 = vadd.f32 %v1972_v43, %v1221_v17  ;;  %v1804_v29 = vpop.f32.mrb[121].mxu0  ;;  %v1974_v30 = vpop.f32.mrb[57].mxu1 }
 0x2b6   : > { %v1805_v48 = vadd.f32 %v1804_v29, %v3273_v53  ;;  %v1975_v36 = vadd.f32 %v1974_v30, %v1221_v17  ;;  %v1806_v33 = vpop.f32.mrb[122].mxu0  ;;  %v1976_v32 = vpop.f32.mrb[58].mxu1 }
 0x2b7   : > { %2077 = vst [vmem:[%s3287_s10 + $0x1c0] sm:$0xff] %v1803_v23  ;;  %2145 = vst [vmem:[%s3287_s10 + $0x3e0] sm:$0xff] %v1973_v24  ;;  %v1807_v42 = vadd.f32 %v1806_v33, %v3271_v52  ;;  %v1977_v58 = vadd.f32 %v1976_v32, %v1226_v49  ;;  %v1808_v59 = vpop.f32.mrb[123].mxu0  ;;  %v1978_v60 = vpop.f32.mrb[59].mxu1 }
 0x2b8   : > { %2078 = vst [vmem:[%s3287_s10 + $0x1c8] sm:$0xff] %v1805_v48  ;;  %2146 = vst [vmem:[%s3287_s10 + $0x3e8] sm:$0xff] %v1975_v36  ;;  %v1809_v61 = vadd.f32 %v1808_v59, %v3271_v52  ;;  %v1979_v26 = vadd.f32 %v1978_v60, %v1226_v49  ;;  %v1236_v53 = vpop.permute.xlu1 %1235  ;;  %v1241_v35 = vpop.permute.xlu0 %1240 }
 0x2b9   : > { %2079 = vst [vmem:[%s3287_s10 + $0x1d0] sm:$0xff] %v1807_v42  ;;  %2147 = vst [vmem:[%s3287_s10 + $0x3f0] sm:$0xff] %v1977_v58 }
 0x2ba   : > { %2080 = vst [vmem:[%s3287_s10 + $0x1d8] sm:$0xff] %v1809_v61  ;;  %2148 = vst [vmem:[%s3287_s10 + $0x3f8] sm:$0xff] %v1979_v26 }
 0x2bc   : > { %v1812_v62 = vpop.f32.mrb[124].mxu0  ;;  %v1982_v39 = vpop.f32.mrb[60].mxu1 }
 0x2bd   : > { %v1813_v31 = vadd.f32 %v1812_v62, %v3277_v55  ;;  %v1983_v45 = vadd.f32 %v1982_v39, %v1231_v10  ;;  %v1814_v63 = vpop.f32.mrb[125].mxu0  ;;  %v1984_v0 = vpop.f32.mrb[61].mxu1 }
 0x2be   : > { %v1815_v52 = vadd.f32 %v1814_v63, %v3277_v55  ;;  %v1985_v1 = vadd.f32 %v1984_v0, %v1231_v10  ;;  %v1816_v2 = vpop.f32.mrb[126].mxu0  ;;  %v1986_v3 = vpop.f32.mrb[62].mxu1 }
 0x2bf   : > { %2081 = vst [vmem:[%s3287_s10 + $0x1e0] sm:$0xff] %v1813_v31  ;;  %2149 = vst [vmem:[%s3287_s10 + $0x400] sm:$0xff] %v1983_v45  ;;  %v1817_v25 = vadd.f32 %v1816_v2, %v3275_v54  ;;  %v1987_v38 = vadd.f32 %v1986_v3, %v1236_v53  ;;  %v1818_v44 = vpop.f32.mrb[127].mxu0  ;;  %v1988_v4 = vpop.f32.mrb[63].mxu1 }
 0x2c0   : > { %2082 = vst [vmem:[%s3287_s10 + $0x1e8] sm:$0xff] %v1815_v52  ;;  %2150 = vst [vmem:[%s3287_s10 + $0x408] sm:$0xff] %v1985_v1  ;;  %v1819_v16 = vadd.f32 %v1818_v44, %v3275_v54  ;;  %v1989_v5 = vadd.f32 %v1988_v4, %v1236_v53  ;;  %v1246_v55 = vpop.permute.xlu1 %1245 }
 0x2c1   : > { %2083 = vst [vmem:[%s3287_s10 + $0x1f0] sm:$0xff] %v1817_v25  ;;  %2151 = vst [vmem:[%s3287_s10 + $0x410] sm:$0xff] %v1987_v38 }
 0x2c2   : > { %2084 = vst [vmem:[%s3287_s10 + $0x1f8] sm:$0xff] %v1819_v16  ;;  %2152 = vst [vmem:[%s3287_s10 + $0x418] sm:$0xff] %v1989_v5 }
 0x2c4   : > { %v1822_v6 = vpop.f32.mrb[128].mxu0  ;;  %v1992_v7 = vpop.f32.mrb[64].mxu1 }
 0x2c5   : > { %v1823_v8 = vadd.f32 %v1822_v6, %v3281_v57  ;;  %v1993_v9 = vadd.f32 %v1992_v7, %v1241_v35  ;;  %v1824_v12 = vpop.f32.mrb[129].mxu0  ;;  %v1994_v47 = vpop.f32.mrb[65].mxu1 }
 0x2c6   : > { %v1825_v54 = vadd.f32 %v1824_v12, %v3281_v57  ;;  %v1995_v41 = vadd.f32 %v1994_v47, %v1241_v35  ;;  %v1826_v13 = vpop.f32.mrb[130].mxu0  ;;  %v1996_v28 = vpop.f32.mrb[66].mxu1 }
 0x2c7   : > { %2085 = vst [vmem:[%s3287_s10 + $0x200] sm:$0xff] %v1823_v8  ;;  %2153 = vst [vmem:[%s3287_s10 + $0x420] sm:$0xff] %v1993_v9  ;;  %v1827_v34 = vadd.f32 %v1826_v13, %v3279_v56  ;;  %v1997_v11 = vadd.f32 %v1996_v28, %v1246_v55  ;;  %v1828_v14 = vpop.f32.mrb[131].mxu0  ;;  %v1998_v21 = vpop.f32.mrb[67].mxu1 }
 0x2c8   : > { %2086 = vst [vmem:[%s3287_s10 + $0x208] sm:$0xff] %v1825_v54  ;;  %2154 = vst [vmem:[%s3287_s10 + $0x428] sm:$0xff] %v1995_v41  ;;  %v1829_v46 = vadd.f32 %v1828_v14, %v3279_v56  ;;  %v1999_v15 = vadd.f32 %v1998_v21, %v1246_v55  ;;  %v1251_v57 = vpop.permute.xlu0 %1250  ;;  %v1256_v51 = vpop.permute.xlu1 %1255 }
 0x2c9   : > { %2087 = vst [vmem:[%s3287_s10 + $0x210] sm:$0xff] %v1827_v34  ;;  %2155 = vst [vmem:[%s3287_s10 + $0x430] sm:$0xff] %v1997_v11 }
 0x2ca   : > { %2088 = vst [vmem:[%s3287_s10 + $0x218] sm:$0xff] %v1829_v46  ;;  %2156 = vst [vmem:[%s3287_s10 + $0x438] sm:$0xff] %v1999_v15 }
 0x2cc   : > { %v2002_v40 = vpop.f32.mrb[68].mxu1  ;;  %v1261_v49 = vpop.permute.xlu0 %1260 }
 0x2cd   : > { %v2003_v18 = vadd.f32 %v2002_v40, %v1251_v57  ;;  %v2004_v50 = vpop.f32.mrb[69].mxu1  ;;  %v1266_v23 = vpop.permute.xlu1 %1265 }
 0x2ce   : > { %v2005_v27 = vadd.f32 %v2004_v50, %v1251_v57  ;;  %v2006_v19 = vpop.f32.mrb[70].mxu1 }
 0x2cf   : > { %2157 = vst [vmem:[%s3287_s10 + $0x440] sm:$0xff] %v2003_v18  ;;  %v2007_v37 = vadd.f32 %v2006_v19, %v1256_v51  ;;  %v2008_v56 = vpop.f32.mrb[71].mxu1 }
 0x2d0   : > { %2158 = vst [vmem:[%s3287_s10 + $0x448] sm:$0xff] %v2005_v27  ;;  %v2009_v22 = vadd.f32 %v2008_v56, %v1256_v51 }
 0x2d1   : > { %2159 = vst [vmem:[%s3287_s10 + $0x450] sm:$0xff] %v2007_v37 }
 0x2d2   : > { %2160 = vst [vmem:[%s3287_s10 + $0x458] sm:$0xff] %v2009_v22 }
 0x2d4   : > { %v2012_v17 = vpop.f32.mrb[72].mxu1 }
 0x2d5   : > { %v2013_v20 = vadd.f32 %v2012_v17, %v1261_v49  ;;  %v2014_v43 = vpop.f32.mrb[73].mxu1 }
 0x2d6   : > { %v2015_v24 = vadd.f32 %v2014_v43, %v1261_v49  ;;  %v2016_v29 = vpop.f32.mrb[74].mxu1 }
 0x2d7   : > { %2161 = vst [vmem:[%s3287_s10 + $0x460] sm:$0xff] %v2013_v20  ;;  %v2017_v30 = vadd.f32 %v2016_v29, %v1266_v23  ;;  %v2018_v48 = vpop.f32.mrb[75].mxu1 }
 0x2d8   : > { %2162 = vst [vmem:[%s3287_s10 + $0x468] sm:$0xff] %v2015_v24  ;;  %v2019_v36 = vadd.f32 %v2018_v48, %v1266_v23 }
 0x2d9   : > { %2163 = vst [vmem:[%s3287_s10 + $0x470] sm:$0xff] %v2017_v30 }
 0x2da   : > { %2164 = vst [vmem:[%s3287_s10 + $0x478] sm:$0xff] %v2019_v36 }
 0x2db PF: > { %s15_s20 = sadd.s32 1, %s2588_s20   ;;  %s3516_s18 = smov %s2584_s19 }
 0x2dc   : > { %p12_p5 = scmp.ge.s32.totalorder %s15_s20, 4   ;;  %s3517_s19 = smov %s3519_s21 }
 0x2de   :  { %14 = sbr.rel (!%p12_p5) target bundleno = 2 (0x2), region = 70 }

</bundles_post_ra>
